<compile_context>
chip_gen: v6e
topology: v6e:2x2x1
jax: 0.10.0
libtpu: 0.0.40
codegen_flags: <defaults>
</compile_context>

<pallas_src>
import functools

import numpy as np
import jax
import jax.numpy as jnp
from jax.experimental import pallas as pl
from jax.experimental.pallas import tpu as pltpu

_LEAD = 8  # aligned zero prologue of every padded scratch (mult of 8, >= pad)


def _round_up(v, m):
    return (v + m - 1) // m * m


def _nbytes(shape, dtype):
    return int(np.prod(shape)) * np.dtype(dtype).itemsize


# ---------------------------------------------------------------------------
# Fused  [GroupNorm+SiLU] -> KxK conv (stride 1/2) -> [bias, +skip]  kernel
# ---------------------------------------------------------------------------
def _fused_conv_kernel(*refs, H, W, Cin, Cout, k, stride, groups, eps,
                       do_gn, do_skip, Wp):
    i = 0
    x_ref = refs[i]; i += 1
    if do_gn:
        gamma_ref, beta_ref, grp_ref = refs[i:i + 3]
        i += 3
    w_ref, b_ref = refs[i:i + 2]
    i += 2
    if do_skip:
        skip_ref = refs[i]
        i += 1
    o_ref = refs[i]
    i += 1
    scratch = refs[i:]

    pad = (k - 1) // 2
    bias = b_ref[...]                                    # (1, Cout) f32

    # ---- prologue: GroupNorm (two-pass, f32) + SiLU, one bf16 cast ---------
    if do_gn:
        xf = x_ref[0].astype(jnp.float32)                # (H*W, Cin)
        a = grp_ref[...]                                 # (G, Cin) 0/1 map
        inv_n = 1.0 / float(H * W * (Cin // groups))
        dims = (((1,), (1,)), ((), ()))
        s1 = jnp.sum(xf, axis=0, keepdims=True)                      # (1,Cin)
        mean_g = jax.lax.dot_general(s1, a, dims,
                                     preferred_element_type=jnp.float32)
        mean_g = mean_g * inv_n                                       # (1,G)
        mean_c = jnp.dot(mean_g, a, preferred_element_type=jnp.float32)
        d = xf - mean_c                                   # centered (2-pass)
        s2 = jnp.sum(d * d, axis=0, keepdims=True)
        var_g = jax.lax.dot_general(s2, a, dims,
                                    preferred_element_type=jnp.float32)
        var_g = var_g * inv_n
        rstd_c = jnp.dot(jax.lax.rsqrt(var_g + eps), a,
                         preferred_element_type=jnp.float32)
        yf = d * (rstd_c * gamma_ref[...]) + beta_ref[...]
        yf = yf * jax.nn.sigmoid(yf)                      # SiLU
        y = yf.astype(jnp.bfloat16)                       # single bf16 cast
    else:
        y = x_ref[0].astype(jnp.bfloat16)

    # ---- 1x1 conv fast path: one MXU matmul, no padded scratch -------------
    if k == 1:
        out = jnp.dot(y, w_ref[0], preferred_element_type=jnp.float32) + bias
        if do_skip:
            out = out + skip_ref[0].astype(jnp.float32)
        o_ref[0] = out.astype(o_ref.dtype)
        return

    zgap = jnp.zeros((Wp - W, Cin), jnp.bfloat16)

    if stride == 1:
        (pbuf,) = scratch                                 # (LB, Cin) bf16
        LB = pbuf.shape[0]
        # Zero only the regions the scatter never overwrites (lead + top pad,
        # bottom pad rows); the interior rows below are written full-pitch.
        head = _LEAD + pad * Wp
        pbuf[0:head, :] = jnp.zeros((head, Cin), jnp.bfloat16)
        tail = LB - (_LEAD + (H + pad) * Wp)
        pbuf[LB - tail:, :] = jnp.zeros((tail, Cin), jnp.bfloat16)
        # Aligned row scatter: data row r starts at _LEAD + (r+pad)*Wp (mult
        # of 8); the row's right pad / next row's left pad are the zgap zeros.
        for r in range(H):
            base = _LEAD + (r + pad) * Wp
            pbuf[base:base + W, :] = y[r * W:(r + 1) * W, :]
            pbuf[base + W:base + Wp, :] = zgap
        # k*k tap matmuls into a LIVE f32 accumulator (no per-tap VMEM RMW).
        M = (H - 1) * Wp + W
        acc = None
        for dy in range(k):
            for dx in range(k):
                start = _LEAD + dy * Wp + dx - pad
                t = jnp.dot(pbuf[start:start + M, :], w_ref[dy * k + dx],
                            preferred_element_type=jnp.float32)
                acc = t if acc is None else acc + t
        # Epilogue: bias + residual skip on the H*W valid rows only.
        # TODO(synk): switch to lax.fori_loop / bulk copy at large H.
        for r in range(H):
            row = acc[r * Wp:r * Wp + W, :] + bias
            if do_skip:
                row = row + skip_ref[0, r * W:(r + 1) * W, :].astype(jnp.float32)
            o_ref[0, r * W:(r + 1) * W, :] = row.astype(o_ref.dtype)
        return

    # ---- stride-2 downsample: row-parity phase split ------------------------
    # Padded rows are de-interleaved by parity into two compact scratches so
    # each tap only reads rows that contribute to the (even-row) outputs.
    pe, po = scratch                                      # even / odd rows
    Ho, Wo = H // 2, W // 2
    pe[0:_LEAD + Wp, :] = jnp.zeros((_LEAD + Wp, Cin), jnp.bfloat16)
    po[0:_LEAD, :] = jnp.zeros((_LEAD, Cin), jnp.bfloat16)
    for r in range(H):
        buf = po if ((r + 1) % 2) else pe                 # padded row r+1
        base = _LEAD + ((r + 1) // 2) * Wp
        buf[base:base + W, :] = y[r * W:(r + 1) * W, :]
        buf[base + W:base + Wp, :] = zgap
    M2 = (Ho - 1) * Wp + W
    acc = None
    for dy in range(3):
        src = pe if dy % 2 == 0 else po
        for dx in range(3):
            start = _LEAD + (dy // 2) * Wp + dx - pad
            t = jnp.dot(src[start:start + M2, :], w_ref[dy * 3 + dx],
                        preferred_element_type=jnp.float32)
            acc = t if acc is None else acc + t
    # Even-column subsample via a tiny 0/1 selection matmul.
    # TODO(synk): column-parity split (4-phase) to remove the remaining 2x.
    sel = (jax.lax.broadcasted_iota(jnp.int32, (Wo, W), 1) ==
           2 * jax.lax.broadcasted_iota(jnp.int32, (Wo, W), 0)
           ).astype(jnp.float32)
    for ro in range(Ho):
        rowfull = acc[ro * Wp:ro * Wp + W, :]
        row = jnp.dot(sel, rowfull, preferred_element_type=jnp.float32) + bias
        o_ref[0, ro * Wo:(ro + 1) * Wo, :] = row.astype(o_ref.dtype)


def fused_conv(x, H, W, w, b, *, stride=1, gn=None, groups=1, skip=None,
               eps=1e-6, out_dtype=jnp.bfloat16):
    """x: (B, H*W, Cin) bf16, w: (k, k, Cin, Cout) f32.  Returns (y, Ho, Wo)."""
    B = x.shape[0]
    k, _, Cin, Cout = w.shape
    assert x.shape == (B, H * W, Cin)
    pad = (k - 1) // 2
    if stride == 1:
        Ho, Wo = H, W
    else:
        assert stride == 2 and k == 3 and H % 2 == 0 and W % 2 == 0
        assert skip is None
        Ho, Wo = H // 2, W // 2

    w2 = w.reshape(k * k, Cin, Cout).astype(jnp.bfloat16)
    b2 = b.reshape(1, Cout).astype(jnp.float32)

    inputs = [x]
    in_specs = [pl.BlockSpec((1, H * W, Cin), lambda n: (n, 0, 0))]
    do_gn = gn is not None
    if do_gn:
        gamma, beta = gn
        grp = jnp.asarray(np.repeat(np.eye(groups, dtype=np.float32),
                                    Cin // groups, axis=1))        # (G, Cin)
        inputs += [gamma.reshape(1, Cin).astype(jnp.float32),
                   beta.reshape(1, Cin).astype(jnp.float32), grp]
        in_specs += [pl.BlockSpec((1, Cin), lambda n: (0, 0)),
                     pl.BlockSpec((1, Cin), lambda n: (0, 0)),
                     pl.BlockSpec((groups, Cin), lambda n: (0, 0))]
    inputs += [w2, b2]
    in_specs += [pl.BlockSpec((k * k, Cin, Cout), lambda n: (0, 0, 0)),
                 pl.BlockSpec((1, Cout), lambda n: (0, 0))]
    do_skip = skip is not None
    if do_skip:
        inputs += [skip]
        in_specs += [pl.BlockSpec((1, H * W, Cout), lambda n: (n, 0, 0))]

    # Padded-scratch geometry: row pitch rounded to a sublane multiple so the
    # scatter stores / dy tap offsets are 8-aligned.
    scratch_shapes = []
    Wp = 0
    scr_rows = 0
    n_scr = 0
    if k > 1:
        Wp = _round_up(W + 2 * pad, 8)
        if stride == 1:
            scr_rows = _LEAD + (H + 2 * pad) * Wp
            n_scr = 1
            scratch_shapes = [pltpu.VMEM((scr_rows, Cin), jnp.bfloat16)]
        else:
            scr_rows = _LEAD + (Ho + 1) * Wp
            n_scr = 2
            scratch_shapes = [pltpu.VMEM((scr_rows, Cin), jnp.bfloat16),
                              pltpu.VMEM((scr_rows, Cin), jnp.bfloat16)]

    # VMEM budget from the actual footprint (double-buffered blocks + scratch
    # + live f32 accumulator), with headroom -- not a flat constant.
    in_bytes = (_nbytes((H * W, Cin), x.dtype) + _nbytes(w2.shape, w2.dtype)
                + _nbytes(b2.shape, b2.dtype))
    if do_gn:
        in_bytes += 3 * _nbytes((groups, Cin), jnp.float32)
    if do_skip:
        in_bytes += _nbytes((H * W, Cout), skip.dtype)
    out_bytes = _nbytes((Ho * Wo, Cout), out_dtype)
    scr_bytes = n_scr * _nbytes((scr_rows, Cin), jnp.bfloat16)
    acc_bytes = _nbytes((max(scr_rows, H * W), Cout), jnp.float32)
    need = 2 * (in_bytes + out_bytes) + scr_bytes + 2 * acc_bytes
    vmem_limit = int(min(max(2 * need + (4 << 20), 16 << 20), 64 << 20))

    kernel = functools.partial(
        _fused_conv_kernel, H=H, W=W, Cin=Cin, Cout=Cout, k=k, stride=stride,
        groups=groups, eps=float(eps), do_gn=do_gn, do_skip=do_skip, Wp=Wp)

    out = pl.pallas_call(
        kernel,
        out_shape=jax.ShapeDtypeStruct((B, Ho * Wo, Cout), out_dtype),
        grid=(B,),
        in_specs=in_specs,
        out_specs=pl.BlockSpec((1, Ho * Wo, Cout), lambda n: (n, 0, 0)),
        scratch_shapes=scratch_shapes,
        compiler_params=pltpu.CompilerParams(
            dimension_semantics=("parallel",),
            vmem_limit_bytes=vmem_limit),
    )(*inputs)
    return out, Ho, Wo


# ---------------------------------------------------------------------------
# Nearest-x2 upsample fused into its 3x3 conv via phase-folded weights.
# ---------------------------------------------------------------------------
_UP_TAPSETS = {0: ([0], [1, 2], []), 1: ([], [0, 1], [2])}


def _fold_upsample_weight(w):
    """Fold (nearest x2 upsample -> conv3x3 pad1) into one 3x3 conv on the
    low-res input producing the 4 output phases stacked along channels."""
    k, _, cin, cout = w.shape
    assert k == 3
    wbig = jnp.zeros((3, 3, cin, 4 * cout), w.dtype)
    for a in (0, 1):
        rset = _UP_TAPSETS[a]
        for bp in (0, 1):
            cset = _UP_TAPSETS[bp]
            ph = (a * 2 + bp) * cout
            for ry in range(3):
                if not rset[ry]:
                    continue
                for cx in range(3):
                    if not cset[cx]:
                        continue
                    acc = 0.0
                    for dy in rset[ry]:
                        for dx in cset[cx]:
                            acc = acc + w[dy, dx]
                    wbig = wbig.at[ry, cx, :, ph:ph + cout].set(acc)
    return wbig


def upsample_conv(x, H, W, p):
    cout = p["w"].shape[3]
    wbig = _fold_upsample_weight(p["w"])
    bbig = jnp.tile(p["b"], 4)
    y, _, _ = fused_conv(x, H, W, wbig, bbig)          # (B, H*W, 4*cout)
    B = y.shape[0]
    # phase interleave: single cheap XLA pass over the small output
    y = y.reshape(B, H, W, 2, 2, cout).transpose(0, 1, 3, 2, 4, 5)
    y = y.reshape(B, 4 * H * W, cout)
    return y, 2 * H, 2 * W


# ---------------------------------------------------------------------------
# ResNet block: GN+SiLU fused into each conv, residual add fused into conv2.
# ---------------------------------------------------------------------------
def resnet_block(x, H, W, p, groups):
    h, _, _ = fused_conv(x, H, W, p["conv1"]["w"], p["conv1"]["b"],
                         gn=(p["norm1"]["gamma"], p["norm1"]["beta"]),
                         groups=groups)
    if "shortcut" in p:
        s, _, _ = fused_conv(x, H, W, p["shortcut"]["w"], p["shortcut"]["b"])
    else:
        s = x
    # dropout = 0.0 (eval semantics) -> no-op
    h, _, _ = fused_conv(h, H, W, p["conv2"]["w"], p["conv2"]["b"],
                         gn=(p["norm2"]["gamma"], p["norm2"]["beta"]),
                         groups=groups, skip=s)
    return h


# ---------------------------------------------------------------------------
# Parameter init (deterministic, synthetic)
# ---------------------------------------------------------------------------
class _KeyGen:
    def __init__(self, key):
        self._key = key

    def __call__(self):
        self._key, sub = jax.random.split(self._key)
        return sub


def _conv_init(key, cin, cout, k):
    kw, kb = jax.random.split(key)
    fan_in = cin * k * k
    return {"w": jax.random.normal(kw, (k, k, cin, cout), jnp.float32)
                 / np.sqrt(fan_in),
            "b": 0.01 * jax.random.normal(kb, (cout,), jnp.float32)}


def _gn_init(key, c):
    kg, kb = jax.random.split(key)
    return {"gamma": 1.0 + 0.02 * jax.random.normal(kg, (c,), jnp.float32),
            "beta": 0.02 * jax.random.normal(kb, (c,), jnp.float32)}


def _resblock_init(kg, cin, cout):
    p = {"norm1": _gn_init(kg(), cin), "conv1": _conv_init(kg(), cin, cout, 3),
         "norm2": _gn_init(kg(), cout), "conv2": _conv_init(kg(), cout, cout, 3)}
    if cin != cout:
        p["shortcut"] = _conv_init(kg(), cin, cout, 1)
    return p


def init_unet(key, cfg):
    assert cfg["dim"] == "2D"
    assert len(cfg["enc_blocks"]) == len(cfg["dec_blocks"]) + 1
    kg = _KeyGen(key)
    C = cfg["channels"]
    L = len(cfg["enc_blocks"])
    p = {"conv_in": _conv_init(kg(), cfg["in_ch"], C, 3)}

    enc_levels = []
    ch = C
    for i, nb in enumerate(cfg["enc_blocks"]):
        cout = C * 2 ** (i + 1)
        blocks, cin = [], ch
        for _ in range(nb):
            blocks.append(_resblock_init(kg, cin, cout))
            cin = cout
        enc_levels.append({"blocks": blocks,
                           "down": _conv_init(kg(), cout, cout, 3)})
        ch = cout
    p["enc_levels"] = enc_levels

    dec_channels = C * 2 ** L
    p["midblock"] = _resblock_init(kg, dec_channels, dec_channels)

    dec_levels = []
    cur = dec_channels
    for t in range(L - 1):
        skip_idx = L - 2 - t
        skip_ch = C * 2 ** (skip_idx + 1)
        nb = cfg["dec_blocks"][skip_idx]
        blocks, cin = [], cur + skip_ch
        for _ in range(nb):
            blocks.append(_resblock_init(kg, cin, skip_ch))
            cin = skip_ch
        dec_levels.append({"up": _conv_init(kg(), cur, cur, 3),
                           "blocks": blocks})
        cur = skip_ch
    p["dec_levels"] = dec_levels
    p["final_up"] = _conv_init(kg(), cur, cur, 3)
    p["norm_out"] = _gn_init(kg(), cur)
    p["conv_out"] = _conv_init(kg(), cur, cfg["out_ch"], 3)
    return p


# ---------------------------------------------------------------------------
# UNet forward:  out_e = Encoder(x);  out = Decoder(out_e);  return (out, out_e)
# ---------------------------------------------------------------------------
def unet_forward(params, x, cfg):
    groups = cfg["groups"]
    B, Cin0, H, W = x.shape
    # single layout/dtype change at the module boundary: NCHW f32 -> flat NHWC bf16
    h = x.transpose(0, 2, 3, 1).reshape(B, H * W, Cin0).astype(jnp.bfloat16)

    # ---- Encoder ----
    h, H, W = fused_conv(h, H, W, params["conv_in"]["w"],
                         params["conv_in"]["b"])
    out_e = []
    for lvl in params["enc_levels"]:
        for blk in lvl["blocks"]:
            h = resnet_block(h, H, W, blk, groups)
        h, H, W = fused_conv(h, H, W, lvl["down"]["w"], lvl["down"]["b"],
                             stride=2)                       # downsample
        out_e.append((h, H, W))

    # ---- Decoder (out_e[-1] is the input, out_e[:-1] are skips) ----
    h, H, W = out_e[-1]
    h = resnet_block(h, H, W, params["midblock"], groups)
    n_skip = len(out_e) - 1
    for t, lvl in enumerate(params["dec_levels"]):
        h, H, W = upsample_conv(h, H, W, lvl["up"])
        skip_h = out_e[n_skip - 1 - t][0]
        # TODO(synk): fuse the channel concat into the next conv (two input
        # refs / weight slices accumulated into the same acc).
        h = jnp.concatenate([h, skip_h], axis=-1)
        for blk in lvl["blocks"]:
            h = resnet_block(h, H, W, blk, groups)
    h, H, W = upsample_conv(h, H, W, params["final_up"])
    out, _, _ = fused_conv(h, H, W, params["conv_out"]["w"],
                           params["conv_out"]["b"],
                           gn=(params["norm_out"]["gamma"],
                               params["norm_out"]["beta"]),
                           groups=groups)

    def to_nchw(t, th, tw):
        b, _, c = t.shape
        return t.astype(jnp.float32).reshape(b, th, tw, c).transpose(0, 3, 1, 2)

    out_nchw = to_nchw(out, H, W)
    out_e_nchw = [to_nchw(e, eh, ew) for (e, eh, ew) in out_e]
    return out_nchw, out_e_nchw


# ---------------------------------------------------------------------------
# Numerical self-checks against lax.conv references (review request)
# ---------------------------------------------------------------------------
def _ref_conv_nhwc(x, w, b, stride, pad):
    out = jax.lax.conv_general_dilated(
        x, w, window_strides=(stride, stride),
        padding=[(pad, pad), (pad, pad)],
        dimension_numbers=("NHWC", "HWIO", "NHWC"))
    return out + b


def _ref_gn_silu(x, gamma, beta, groups, eps):
    B, H, W, C = x.shape
    xg = x.reshape(B, H, W, groups, C // groups)
    mu = xg.mean(axis=(1, 2, 4), keepdims=True)
    var = xg.var(axis=(1, 2, 4), keepdims=True)
    y = ((xg - mu) * jax.lax.rsqrt(var + eps)).reshape(B, H, W, C)
    y = y * gamma + beta
    return y * jax.nn.sigmoid(y)


def _assert_close(got, want, name, atol=5e-2, rtol=5e-2):
    got = np.asarray(got).astype(np.float32)
    want = np.asarray(want).astype(np.float32)
    if not np.allclose(got, want, rtol=rtol, atol=atol):
        raise AssertionError(
            f"{name}: max abs err {np.max(np.abs(got - want)):.4e}")


def _self_check():
    key = jax.random.PRNGKey(42)
    ks = jax.random.split(key, 8)
    B, H, W, Cin, Cout, G, eps = 2, 8, 8, 8, 8, 2, 1e-6
    x = jax.random.normal(ks[0], (B, H, W, Cin), jnp.float32)
    w3 = jax.random.normal(ks[1], (3, 3, Cin, Cout), jnp.float32) / np.sqrt(9 * Cin)
    w1 = jax.random.normal(ks[2], (1, 1, Cin, Cout), jnp.float32) / np.sqrt(Cin)
    b = 0.1 * jax.random.normal(ks[3], (Cout,), jnp.float32)
    gamma = 1.0 + 0.1 * jax.random.normal(ks[4], (Cin,), jnp.float32)
    beta = 0.1 * jax.random.normal(ks[5], (Cin,), jnp.float32)

    xbf = x.astype(jnp.bfloat16)
    xq = xbf.astype(jnp.float32)                     # bf16-rounded reference in
    wq3 = w3.astype(jnp.bfloat16).astype(jnp.float32)
    wq1 = w1.astype(jnp.bfloat16).astype(jnp.float32)
    xflat = xbf.reshape(B, H * W, Cin)

    def nhwc(t, h, w_, c):
        return t.astype(jnp.float32).reshape(B, h, w_, c)

    y, _, _ = fused_conv(xflat, H, W, w3, b)
    _assert_close(nhwc(y, H, W, Cout), _ref_conv_nhwc(xq, wq3, b, 1, 1),
                  "conv3x3")

    y, _, _ = fused_conv(xflat, H, W, w3, b, gn=(gamma, beta), groups=G, eps=eps)
    _assert_close(nhwc(y, H, W, Cout),
                  _ref_conv_nhwc(_ref_gn_silu(xq, gamma, beta, G, eps),
                                 wq3, b, 1, 1),
                  "gn_silu_conv3x3")

    skipv = jax.random.normal(ks[6], (B, H * W, Cout), jnp.float32
                              ).astype(jnp.bfloat16)
    y, _, _ = fused_conv(xflat, H, W, w1, b, skip=skipv)
    ref = (_ref_conv_nhwc(xq, wq1, b, 1, 0)
           + skipv.astype(jnp.float32).reshape(B, H, W, Cout))
    _assert_close(nhwc(y, H, W, Cout), ref, "conv1x1_skip")

    y, Ho, Wo = fused_conv(xflat, H, W, w3, b, stride=2)
    _assert_close(nhwc(y, Ho, Wo, Cout), _ref_conv_nhwc(xq, wq3, b, 2, 1),
                  "conv3x3_stride2")

    y, H2, W2 = upsample_conv(xflat, H, W, {"w": w3, "b": b})
    up = jnp.repeat(jnp.repeat(xq, 2, axis=1), 2, axis=2)
    _assert_close(nhwc(y, H2, W2, Cout), _ref_conv_nhwc(up, wq3, b, 1, 1),
                  "upsample_conv3x3")


# ---------------------------------------------------------------------------
# main
# ---------------------------------------------------------------------------
if __name__ == "__main__":
    _self_check()

    cfg = dict(channels=4, groups=2, in_ch=4, out_ch=4,
               enc_blocks=[1, 1], dec_blocks=[1], dim="2D",
               act=None, with_conv=True, dropout=0.0)

    key = jax.random.PRNGKey(0)
    kx, kp = jax.random.split(key)
    x = jax.random.normal(kx, (2, cfg["in_ch"], 16, 16), jnp.float32)
    params = init_unet(kp, cfg)

    fwd = jax.jit(lambda p, xx: unet_forward(p, xx, cfg))
    out, out_e = fwd(params, x)
    jax.block_until_ready((out, out_e))

    assert out.shape == (2, cfg["out_ch"], 16, 16)
    assert out_e[0].shape == (2, 8, 8, 8)
    assert out_e[1].shape == (2, 16, 4, 4)
    assert all(bool(jnp.all(jnp.isfinite(t))) for t in [out] + list(out_e))
    print("KERNEL_OK")
</pallas_src>

<mosaic_0001>
module attributes {stable_mosaic.version = 11 : i64} {
  func.func @_fused_conv_kernel(%arg0: i32, %arg1: memref<1x64x8xbf16, #tpu.memory_space<vmem>>, %arg2: memref<9x8x8xbf16, #tpu.memory_space<vmem>>, %arg3: memref<1x8xf32, #tpu.memory_space<vmem>>, %arg4: memref<1x64x8xbf16, #tpu.memory_space<vmem>>, %arg5: memref<168x8xbf16, #tpu.memory_space<vmem>>) attributes {dimension_semantics = [#tpu.dimension_semantics<parallel>], iteration_bounds = array<i64: 2>, scalar_prefetch = 0 : i64, scratch_operands = 1 : i64, tpu.core_type = #tpu.core_type<tc>, window_params = [{transform_indices = @transform_0, window_bounds = array<i64: 1, 64, 8>}, {pipeline_mode = #tpu.pipeline_mode<synchronous>, transform_indices = @transform_1, window_bounds = array<i64: 9, 8, 8>}, {pipeline_mode = #tpu.pipeline_mode<synchronous>, transform_indices = @transform_2, window_bounds = array<i64: 1, 8>}, {transform_indices = @transform_3, window_bounds = array<i64: 1, 64, 8>}]} {
    %c0 = arith.constant 0 : index
    %c0_0 = arith.constant 0 : index
    %0 = vector.load %arg3[%c0, %c0_0] : memref<1x8xf32, #tpu.memory_space<vmem>>, vector<1x8xf32>
    %c0_1 = arith.constant 0 : index
    %c0_2 = arith.constant 0 : index
    %c0_3 = arith.constant 0 : index
    %1 = vector.load %arg1[%c0_1, %c0_2, %c0_3] : memref<1x64x8xbf16, #tpu.memory_space<vmem>>, vector<1x64x8xbf16>
    %2 = vector.shape_cast %1 : vector<1x64x8xbf16> to vector<64x8xbf16>
    %cst = arith.constant 0.000000e+00 : bf16
    %3 = vector.broadcast %cst : bf16 to vector<8x8xbf16>
    %cst_4 = arith.constant 0.000000e+00 : bf16
    %4 = vector.broadcast %cst_4 : bf16 to vector<24x8xbf16>
    %c0_5 = arith.constant 0 : index
    %c0_6 = arith.constant 0 : index
    %5 = vector.load %arg5[%c0_5, %c0_6] : memref<168x8xbf16, #tpu.memory_space<vmem>>, vector<24x8xbf16>
    tpu.vector_store %arg5[%c0_5, %c0_6], %4 {strides = array<i32>} : memref<168x8xbf16, #tpu.memory_space<vmem>>, vector<24x8xbf16>,
    %cst_7 = arith.constant 0.000000e+00 : bf16
    %6 = vector.broadcast %cst_7 : bf16 to vector<16x8xbf16>
    %c152 = arith.constant 152 : index
    %c0_8 = arith.constant 0 : index
    %7 = vector.load %arg5[%c152, %c0_8] : memref<168x8xbf16, #tpu.memory_space<vmem>>, vector<16x8xbf16>
    tpu.vector_store %arg5[%c152, %c0_8], %6 {strides = array<i32>} : memref<168x8xbf16, #tpu.memory_space<vmem>>, vector<16x8xbf16>,
    %8 = vector.extract_strided_slice %2 {offsets = [0, 0], sizes = [8, 8], strides = [1, 1]} : vector<64x8xbf16> to vector<8x8xbf16>
    %c24 = arith.constant 24 : index
    %c0_9 = arith.constant 0 : index
    %9 = vector.load %arg5[%c24, %c0_9] : memref<168x8xbf16, #tpu.memory_space<vmem>>, vector<8x8xbf16>
    tpu.vector_store %arg5[%c24, %c0_9], %8 {strides = array<i32>} : memref<168x8xbf16, #tpu.memory_space<vmem>>, vector<8x8xbf16>,
    %c32 = arith.constant 32 : index
    %c0_10 = arith.constant 0 : index
    %10 = vector.load %arg5[%c32, %c0_10] : memref<168x8xbf16, #tpu.memory_space<vmem>>, vector<8x8xbf16>
    tpu.vector_store %arg5[%c32, %c0_10], %3 {strides = array<i32>} : memref<168x8xbf16, #tpu.memory_space<vmem>>, vector<8x8xbf16>,
    %11 = vector.extract_strided_slice %2 {offsets = [8, 0], sizes = [8, 8], strides = [1, 1]} : vector<64x8xbf16> to vector<8x8xbf16>
    %c40 = arith.constant 40 : index
    %c0_11 = arith.constant 0 : index
    %12 = vector.load %arg5[%c40, %c0_11] : memref<168x8xbf16, #tpu.memory_space<vmem>>, vector<8x8xbf16>
    tpu.vector_store %arg5[%c40, %c0_11], %11 {strides = array<i32>} : memref<168x8xbf16, #tpu.memory_space<vmem>>, vector<8x8xbf16>,
    %c48 = arith.constant 48 : index
    %c0_12 = arith.constant 0 : index
    %13 = vector.load %arg5[%c48, %c0_12] : memref<168x8xbf16, #tpu.memory_space<vmem>>, vector<8x8xbf16>
    tpu.vector_store %arg5[%c48, %c0_12], %3 {strides = array<i32>} : memref<168x8xbf16, #tpu.memory_space<vmem>>, vector<8x8xbf16>,
    %14 = vector.extract_strided_slice %2 {offsets = [16, 0], sizes = [8, 8], strides = [1, 1]} : vector<64x8xbf16> to vector<8x8xbf16>
    %c56 = arith.constant 56 : index
    %c0_13 = arith.constant 0 : index
    %15 = vector.load %arg5[%c56, %c0_13] : memref<168x8xbf16, #tpu.memory_space<vmem>>, vector<8x8xbf16>
    tpu.vector_store %arg5[%c56, %c0_13], %14 {strides = array<i32>} : memref<168x8xbf16, #tpu.memory_space<vmem>>, vector<8x8xbf16>,
    %c64 = arith.constant 64 : index
    %c0_14 = arith.constant 0 : index
    %16 = vector.load %arg5[%c64, %c0_14] : memref<168x8xbf16, #tpu.memory_space<vmem>>, vector<8x8xbf16>
    tpu.vector_store %arg5[%c64, %c0_14], %3 {strides = array<i32>} : memref<168x8xbf16, #tpu.memory_space<vmem>>, vector<8x8xbf16>,
    %17 = vector.extract_strided_slice %2 {offsets = [24, 0], sizes = [8, 8], strides = [1, 1]} : vector<64x8xbf16> to vector<8x8xbf16>
    %c72 = arith.constant 72 : index
    %c0_15 = arith.constant 0 : index
    %18 = vector.load %arg5[%c72, %c0_15] : memref<168x8xbf16, #tpu.memory_space<vmem>>, vector<8x8xbf16>
    tpu.vector_store %arg5[%c72, %c0_15], %17 {strides = array<i32>} : memref<168x8xbf16, #tpu.memory_space<vmem>>, vector<8x8xbf16>,
    %c80 = arith.constant 80 : index
    %c0_16 = arith.constant 0 : index
    %19 = vector.load %arg5[%c80, %c0_16] : memref<168x8xbf16, #tpu.memory_space<vmem>>, vector<8x8xbf16>
    tpu.vector_store %arg5[%c80, %c0_16], %3 {strides = array<i32>} : memref<168x8xbf16, #tpu.memory_space<vmem>>, vector<8x8xbf16>,
    %20 = vector.extract_strided_slice %2 {offsets = [32, 0], sizes = [8, 8], strides = [1, 1]} : vector<64x8xbf16> to vector<8x8xbf16>
    %c88 = arith.constant 88 : index
    %c0_17 = arith.constant 0 : index
    %21 = vector.load %arg5[%c88, %c0_17] : memref<168x8xbf16, #tpu.memory_space<vmem>>, vector<8x8xbf16>
    tpu.vector_store %arg5[%c88, %c0_17], %20 {strides = array<i32>} : memref<168x8xbf16, #tpu.memory_space<vmem>>, vector<8x8xbf16>,
    %c96 = arith.constant 96 : index
    %c0_18 = arith.constant 0 : index
    %22 = vector.load %arg5[%c96, %c0_18] : memref<168x8xbf16, #tpu.memory_space<vmem>>, vector<8x8xbf16>
    tpu.vector_store %arg5[%c96, %c0_18], %3 {strides = array<i32>} : memref<168x8xbf16, #tpu.memory_space<vmem>>, vector<8x8xbf16>,
    %23 = vector.extract_strided_slice %2 {offsets = [40, 0], sizes = [8, 8], strides = [1, 1]} : vector<64x8xbf16> to vector<8x8xbf16>
    %c104 = arith.constant 104 : index
    %c0_19 = arith.constant 0 : index
    %24 = vector.load %arg5[%c104, %c0_19] : memref<168x8xbf16, #tpu.memory_space<vmem>>, vector<8x8xbf16>
    tpu.vector_store %arg5[%c104, %c0_19], %23 {strides = array<i32>} : memref<168x8xbf16, #tpu.memory_space<vmem>>, vector<8x8xbf16>,
    %c112 = arith.constant 112 : index
    %c0_20 = arith.constant 0 : index
    %25 = vector.load %arg5[%c112, %c0_20] : memref<168x8xbf16, #tpu.memory_space<vmem>>, vector<8x8xbf16>
    tpu.vector_store %arg5[%c112, %c0_20], %3 {strides = array<i32>} : memref<168x8xbf16, #tpu.memory_space<vmem>>, vector<8x8xbf16>,
    %26 = vector.extract_strided_slice %2 {offsets = [48, 0], sizes = [8, 8], strides = [1, 1]} : vector<64x8xbf16> to vector<8x8xbf16>
    %c120 = arith.constant 120 : index
    %c0_21 = arith.constant 0 : index
    %27 = vector.load %arg5[%c120, %c0_21] : memref<168x8xbf16, #tpu.memory_space<vmem>>, vector<8x8xbf16>
    tpu.vector_store %arg5[%c120, %c0_21], %26 {strides = array<i32>} : memref<168x8xbf16, #tpu.memory_space<vmem>>, vector<8x8xbf16>,
    %c128 = arith.constant 128 : index
    %c0_22 = arith.constant 0 : index
    %28 = vector.load %arg5[%c128, %c0_22] : memref<168x8xbf16, #tpu.memory_space<vmem>>, vector<8x8xbf16>
    tpu.vector_store %arg5[%c128, %c0_22], %3 {strides = array<i32>} : memref<168x8xbf16, #tpu.memory_space<vmem>>, vector<8x8xbf16>,
    %29 = vector.extract_strided_slice %2 {offsets = [56, 0], sizes = [8, 8], strides = [1, 1]} : vector<64x8xbf16> to vector<8x8xbf16>
    %c136 = arith.constant 136 : index
    %c0_23 = arith.constant 0 : index
    %30 = vector.load %arg5[%c136, %c0_23] : memref<168x8xbf16, #tpu.memory_space<vmem>>, vector<8x8xbf16>
    tpu.vector_store %arg5[%c136, %c0_23], %29 {strides = array<i32>} : memref<168x8xbf16, #tpu.memory_space<vmem>>, vector<8x8xbf16>,
    %c144 = arith.constant 144 : index
    %c0_24 = arith.constant 0 : index
    %31 = vector.load %arg5[%c144, %c0_24] : memref<168x8xbf16, #tpu.memory_space<vmem>>, vector<8x8xbf16>
    tpu.vector_store %arg5[%c144, %c0_24], %3 {strides = array<i32>} : memref<168x8xbf16, #tpu.memory_space<vmem>>, vector<8x8xbf16>,
    %c7 = arith.constant 7 : index
    %c0_25 = arith.constant 0 : index
    %32 = vector.load %arg5[%c7, %c0_25] : memref<168x8xbf16, #tpu.memory_space<vmem>>, vector<120x8xbf16>
    %c0_26 = arith.constant 0 : index
    %c0_27 = arith.constant 0 : index
    %c0_28 = arith.constant 0 : index
    %33 = vector.load %arg2[%c0_26, %c0_27, %c0_28] : memref<9x8x8xbf16, #tpu.memory_space<vmem>>, vector<1x8x8xbf16>
    %34 = vector.shape_cast %33 : vector<1x8x8xbf16> to vector<8x8xbf16>
    %cst_29 = arith.constant dense<0.000000e+00> : vector<120x8xf32>
    %35 = tpu.matmul %32, %34, %cst_29 {dimension_numbers = #tpu.dot_dimension_numbers<[1], [0], [0], [1], [0, 0, 1, 1], [], []>} : vector<120x8xbf16>, vector<8x8xbf16>, vector<120x8xf32> -> vector<120x8xf32>
    %c8 = arith.constant 8 : index
    %c0_30 = arith.constant 0 : index
    %36 = vector.load %arg5[%c8, %c0_30] : memref<168x8xbf16, #tpu.memory_space<vmem>>, vector<120x8xbf16>
    %c1 = arith.constant 1 : index
    %c0_31 = arith.constant 0 : index
    %c0_32 = arith.constant 0 : index
    %37 = vector.load %arg2[%c1, %c0_31, %c0_32] : memref<9x8x8xbf16, #tpu.memory_space<vmem>>, vector<1x8x8xbf16>
    %38 = vector.shape_cast %37 : vector<1x8x8xbf16> to vector<8x8xbf16>
    %cst_33 = arith.constant dense<0.000000e+00> : vector<120x8xf32>
    %39 = tpu.matmul %36, %38, %cst_33 {dimension_numbers = #tpu.dot_dimension_numbers<[1], [0], [0], [1], [0, 0, 1, 1], [], []>} : vector<120x8xbf16>, vector<8x8xbf16>, vector<120x8xf32> -> vector<120x8xf32>
    %40 = arith.addf %35, %39 : vector<120x8xf32>
    %c9 = arith.constant 9 : index
    %c0_34 = arith.constant 0 : index
    %41 = vector.load %arg5[%c9, %c0_34] : memref<168x8xbf16, #tpu.memory_space<vmem>>, vector<120x8xbf16>
    %c2 = arith.constant 2 : index
    %c0_35 = arith.constant 0 : index
    %c0_36 = arith.constant 0 : index
    %42 = vector.load %arg2[%c2, %c0_35, %c0_36] : memref<9x8x8xbf16, #tpu.memory_space<vmem>>, vector<1x8x8xbf16>
    %43 = vector.shape_cast %42 : vector<1x8x8xbf16> to vector<8x8xbf16>
    %cst_37 = arith.constant dense<0.000000e+00> : vector<120x8xf32>
    %44 = tpu.matmul %41, %43, %cst_37 {dimension_numbers = #tpu.dot_dimension_numbers<[1], [0], [0], [1], [0, 0, 1, 1], [], []>} : vector<120x8xbf16>, vector<8x8xbf16>, vector<120x8xf32> -> vector<120x8xf32>
    %45 = arith.addf %40, %44 : vector<120x8xf32>
    %c23 = arith.constant 23 : index
    %c0_38 = arith.constant 0 : index
    %46 = vector.load %arg5[%c23, %c0_38] : memref<168x8xbf16, #tpu.memory_space<vmem>>, vector<120x8xbf16>
    %c3 = arith.constant 3 : index
    %c0_39 = arith.constant 0 : index
    %c0_40 = arith.constant 0 : index
    %47 = vector.load %arg2[%c3, %c0_39, %c0_40] : memref<9x8x8xbf16, #tpu.memory_space<vmem>>, vector<1x8x8xbf16>
    %48 = vector.shape_cast %47 : vector<1x8x8xbf16> to vector<8x8xbf16>
    %cst_41 = arith.constant dense<0.000000e+00> : vector<120x8xf32>
    %49 = tpu.matmul %46, %48, %cst_41 {dimension_numbers = #tpu.dot_dimension_numbers<[1], [0], [0], [1], [0, 0, 1, 1], [], []>} : vector<120x8xbf16>, vector<8x8xbf16>, vector<120x8xf32> -> vector<120x8xf32>
    %50 = arith.addf %45, %49 : vector<120x8xf32>
    %c24_42 = arith.constant 24 : index
    %c0_43 = arith.constant 0 : index
    %51 = vector.load %arg5[%c24_42, %c0_43] : memref<168x8xbf16, #tpu.memory_space<vmem>>, vector<120x8xbf16>
    %c4 = arith.constant 4 : index
    %c0_44 = arith.constant 0 : index
    %c0_45 = arith.constant 0 : index
    %52 = vector.load %arg2[%c4, %c0_44, %c0_45] : memref<9x8x8xbf16, #tpu.memory_space<vmem>>, vector<1x8x8xbf16>
    %53 = vector.shape_cast %52 : vector<1x8x8xbf16> to vector<8x8xbf16>
    %cst_46 = arith.constant dense<0.000000e+00> : vector<120x8xf32>
    %54 = tpu.matmul %51, %53, %cst_46 {dimension_numbers = #tpu.dot_dimension_numbers<[1], [0], [0], [1], [0, 0, 1, 1], [], []>} : vector<120x8xbf16>, vector<8x8xbf16>, vector<120x8xf32> -> vector<120x8xf32>
    %55 = arith.addf %50, %54 : vector<120x8xf32>
    %c25 = arith.constant 25 : index
    %c0_47 = arith.constant 0 : index
    %56 = vector.load %arg5[%c25, %c0_47] : memref<168x8xbf16, #tpu.memory_space<vmem>>, vector<120x8xbf16>
    %c5 = arith.constant 5 : index
    %c0_48 = arith.constant 0 : index
    %c0_49 = arith.constant 0 : index
    %57 = vector.load %arg2[%c5, %c0_48, %c0_49] : memref<9x8x8xbf16, #tpu.memory_space<vmem>>, vector<1x8x8xbf16>
    %58 = vector.shape_cast %57 : vector<1x8x8xbf16> to vector<8x8xbf16>
    %cst_50 = arith.constant dense<0.000000e+00> : vector<120x8xf32>
    %59 = tpu.matmul %56, %58, %cst_50 {dimension_numbers = #tpu.dot_dimension_numbers<[1], [0], [0], [1], [0, 0, 1, 1], [], []>} : vector<120x8xbf16>, vector<8x8xbf16>, vector<120x8xf32> -> vector<120x8xf32>
    %60 = arith.addf %55, %59 : vector<120x8xf32>
    %c39 = arith.constant 39 : index
    %c0_51 = arith.constant 0 : index
    %61 = vector.load %arg5[%c39, %c0_51] : memref<168x8xbf16, #tpu.memory_space<vmem>>, vector<120x8xbf16>
    %c6 = arith.constant 6 : index
    %c0_52 = arith.constant 0 : index
    %c0_53 = arith.constant 0 : index
    %62 = vector.load %arg2[%c6, %c0_52, %c0_53] : memref<9x8x8xbf16, #tpu.memory_space<vmem>>, vector<1x8x8xbf16>
    %63 = vector.shape_cast %62 : vector<1x8x8xbf16> to vector<8x8xbf16>
    %cst_54 = arith.constant dense<0.000000e+00> : vector<120x8xf32>
    %64 = tpu.matmul %61, %63, %cst_54 {dimension_numbers = #tpu.dot_dimension_numbers<[1], [0], [0], [1], [0, 0, 1, 1], [], []>} : vector<120x8xbf16>, vector<8x8xbf16>, vector<120x8xf32> -> vector<120x8xf32>
    %65 = arith.addf %60, %64 : vector<120x8xf32>
    %c40_55 = arith.constant 40 : index
    %c0_56 = arith.constant 0 : index
    %66 = vector.load %arg5[%c40_55, %c0_56] : memref<168x8xbf16, #tpu.memory_space<vmem>>, vector<120x8xbf16>
    %c7_57 = arith.constant 7 : index
    %c0_58 = arith.constant 0 : index
    %c0_59 = arith.constant 0 : index
    %67 = vector.load %arg2[%c7_57, %c0_58, %c0_59] : memref<9x8x8xbf16, #tpu.memory_space<vmem>>, vector<1x8x8xbf16>
    %68 = vector.shape_cast %67 : vector<1x8x8xbf16> to vector<8x8xbf16>
    %cst_60 = arith.constant dense<0.000000e+00> : vector<120x8xf32>
    %69 = tpu.matmul %66, %68, %cst_60 {dimension_numbers = #tpu.dot_dimension_numbers<[1], [0], [0], [1], [0, 0, 1, 1], [], []>} : vector<120x8xbf16>, vector<8x8xbf16>, vector<120x8xf32> -> vector<120x8xf32>
    %70 = arith.addf %65, %69 : vector<120x8xf32>
    %c41 = arith.constant 41 : index
    %c0_61 = arith.constant 0 : index
    %71 = vector.load %arg5[%c41, %c0_61] : memref<168x8xbf16, #tpu.memory_space<vmem>>, vector<120x8xbf16>
    %c8_62 = arith.constant 8 : index
    %c0_63 = arith.constant 0 : index
    %c0_64 = arith.constant 0 : index
    %72 = vector.load %arg2[%c8_62, %c0_63, %c0_64] : memref<9x8x8xbf16, #tpu.memory_space<vmem>>, vector<1x8x8xbf16>
    %73 = vector.shape_cast %72 : vector<1x8x8xbf16> to vector<8x8xbf16>
    %cst_65 = arith.constant dense<0.000000e+00> : vector<120x8xf32>
    %74 = tpu.matmul %71, %73, %cst_65 {dimension_numbers = #tpu.dot_dimension_numbers<[1], [0], [0], [1], [0, 0, 1, 1], [], []>} : vector<120x8xbf16>, vector<8x8xbf16>, vector<120x8xf32> -> vector<120x8xf32>
    %75 = arith.addf %70, %74 : vector<120x8xf32>
    %76 = vector.extract_strided_slice %75 {offsets = [0, 0], sizes = [8, 8], strides = [1, 1]} : vector<120x8xf32> to vector<8x8xf32>
    %77 = vector.broadcast %0 : vector<1x8xf32> to vector<8x8xf32>
    %78 = arith.addf %76, %77 : vector<8x8xf32>
    %79 = arith.truncf %78 : vector<8x8xf32> to vector<8x8xbf16>
    %c0_66 = arith.constant 0 : index
    %c0_67 = arith.constant 0 : index
    %c0_68 = arith.constant 0 : index
    %80 = vector.load %arg4[%c0_66, %c0_67, %c0_68] : memref<1x64x8xbf16, #tpu.memory_space<vmem>>, vector<1x8x8xbf16>
    %81 = vector.shape_cast %80 : vector<1x8x8xbf16> to vector<8x8xbf16>
    %82 = vector.shape_cast %79 : vector<8x8xbf16> to vector<1x8x8xbf16>
    tpu.vector_store %arg4[%c0_66, %c0_67, %c0_68], %82 {strides = array<i32>} : memref<1x64x8xbf16, #tpu.memory_space<vmem>>, vector<1x8x8xbf16>,
    %83 = vector.extract_strided_slice %75 {offsets = [16, 0], sizes = [8, 8], strides = [1, 1]} : vector<120x8xf32> to vector<8x8xf32>
    %84 = vector.broadcast %0 : vector<1x8xf32> to vector<8x8xf32>
    %85 = arith.addf %83, %84 : vector<8x8xf32>
    %86 = arith.truncf %85 : vector<8x8xf32> to vector<8x8xbf16>
    %c0_69 = arith.constant 0 : index
    %c8_70 = arith.constant 8 : index
    %c0_71 = arith.constant 0 : index
    %87 = vector.load %arg4[%c0_69, %c8_70, %c0_71] : memref<1x64x8xbf16, #tpu.memory_space<vmem>>, vector<1x8x8xbf16>
    %88 = vector.shape_cast %87 : vector<1x8x8xbf16> to vector<8x8xbf16>
    %89 = vector.shape_cast %86 : vector<8x8xbf16> to vector<1x8x8xbf16>
    tpu.vector_store %arg4[%c0_69, %c8_70, %c0_71], %89 {strides = array<i32>} : memref<1x64x8xbf16, #tpu.memory_space<vmem>>, vector<1x8x8xbf16>,
    %90 = vector.extract_strided_slice %75 {offsets = [32, 0], sizes = [8, 8], strides = [1, 1]} : vector<120x8xf32> to vector<8x8xf32>
    %91 = vector.broadcast %0 : vector<1x8xf32> to vector<8x8xf32>
    %92 = arith.addf %90, %91 : vector<8x8xf32>
    %93 = arith.truncf %92 : vector<8x8xf32> to vector<8x8xbf16>
    %c0_72 = arith.constant 0 : index
    %c16 = arith.constant 16 : index
    %c0_73 = arith.constant 0 : index
    %94 = vector.load %arg4[%c0_72, %c16, %c0_73] : memref<1x64x8xbf16, #tpu.memory_space<vmem>>, vector<1x8x8xbf16>
    %95 = vector.shape_cast %94 : vector<1x8x8xbf16> to vector<8x8xbf16>
    %96 = vector.shape_cast %93 : vector<8x8xbf16> to vector<1x8x8xbf16>
    tpu.vector_store %arg4[%c0_72, %c16, %c0_73], %96 {strides = array<i32>} : memref<1x64x8xbf16, #tpu.memory_space<vmem>>, vector<1x8x8xbf16>,
    %97 = vector.extract_strided_slice %75 {offsets = [48, 0], sizes = [8, 8], strides = [1, 1]} : vector<120x8xf32> to vector<8x8xf32>
    %98 = vector.broadcast %0 : vector<1x8xf32> to vector<8x8xf32>
    %99 = arith.addf %97, %98 : vector<8x8xf32>
    %100 = arith.truncf %99 : vector<8x8xf32> to vector<8x8xbf16>
    %c0_74 = arith.constant 0 : index
    %c24_75 = arith.constant 24 : index
    %c0_76 = arith.constant 0 : index
    %101 = vector.load %arg4[%c0_74, %c24_75, %c0_76] : memref<1x64x8xbf16, #tpu.memory_space<vmem>>, vector<1x8x8xbf16>
    %102 = vector.shape_cast %101 : vector<1x8x8xbf16> to vector<8x8xbf16>
    %103 = vector.shape_cast %100 : vector<8x8xbf16> to vector<1x8x8xbf16>
    tpu.vector_store %arg4[%c0_74, %c24_75, %c0_76], %103 {strides = array<i32>} : memref<1x64x8xbf16, #tpu.memory_space<vmem>>, vector<1x8x8xbf16>,
    %104 = vector.extract_strided_slice %75 {offsets = [64, 0], sizes = [8, 8], strides = [1, 1]} : vector<120x8xf32> to vector<8x8xf32>
    %105 = vector.broadcast %0 : vector<1x8xf32> to vector<8x8xf32>
    %106 = arith.addf %104, %105 : vector<8x8xf32>
    %107 = arith.truncf %106 : vector<8x8xf32> to vector<8x8xbf16>
    %c0_77 = arith.constant 0 : index
    %c32_78 = arith.constant 32 : index
    %c0_79 = arith.constant 0 : index
    %108 = vector.load %arg4[%c0_77, %c32_78, %c0_79] : memref<1x64x8xbf16, #tpu.memory_space<vmem>>, vector<1x8x8xbf16>
    %109 = vector.shape_cast %108 : vector<1x8x8xbf16> to vector<8x8xbf16>
    %110 = vector.shape_cast %107 : vector<8x8xbf16> to vector<1x8x8xbf16>
    tpu.vector_store %arg4[%c0_77, %c32_78, %c0_79], %110 {strides = array<i32>} : memref<1x64x8xbf16, #tpu.memory_space<vmem>>, vector<1x8x8xbf16>,
    %111 = vector.extract_strided_slice %75 {offsets = [80, 0], sizes = [8, 8], strides = [1, 1]} : vector<120x8xf32> to vector<8x8xf32>
    %112 = vector.broadcast %0 : vector<1x8xf32> to vector<8x8xf32>
    %113 = arith.addf %111, %112 : vector<8x8xf32>
    %114 = arith.truncf %113 : vector<8x8xf32> to vector<8x8xbf16>
    %c0_80 = arith.constant 0 : index
    %c40_81 = arith.constant 40 : index
    %c0_82 = arith.constant 0 : index
    %115 = vector.load %arg4[%c0_80, %c40_81, %c0_82] : memref<1x64x8xbf16, #tpu.memory_space<vmem>>, vector<1x8x8xbf16>
    %116 = vector.shape_cast %115 : vector<1x8x8xbf16> to vector<8x8xbf16>
    %117 = vector.shape_cast %114 : vector<8x8xbf16> to vector<1x8x8xbf16>
    tpu.vector_store %arg4[%c0_80, %c40_81, %c0_82], %117 {strides = array<i32>} : memref<1x64x8xbf16, #tpu.memory_space<vmem>>, vector<1x8x8xbf16>,
    %118 = vector.extract_strided_slice %75 {offsets = [96, 0], sizes = [8, 8], strides = [1, 1]} : vector<120x8xf32> to vector<8x8xf32>
    %119 = vector.broadcast %0 : vector<1x8xf32> to vector<8x8xf32>
    %120 = arith.addf %118, %119 : vector<8x8xf32>
    %121 = arith.truncf %120 : vector<8x8xf32> to vector<8x8xbf16>
    %c0_83 = arith.constant 0 : index
    %c48_84 = arith.constant 48 : index
    %c0_85 = arith.constant 0 : index
    %122 = vector.load %arg4[%c0_83, %c48_84, %c0_85] : memref<1x64x8xbf16, #tpu.memory_space<vmem>>, vector<1x8x8xbf16>
    %123 = vector.shape_cast %122 : vector<1x8x8xbf16> to vector<8x8xbf16>
    %124 = vector.shape_cast %121 : vector<8x8xbf16> to vector<1x8x8xbf16>
    tpu.vector_store %arg4[%c0_83, %c48_84, %c0_85], %124 {strides = array<i32>} : memref<1x64x8xbf16, #tpu.memory_space<vmem>>, vector<1x8x8xbf16>,
    %125 = vector.extract_strided_slice %75 {offsets = [112, 0], sizes = [8, 8], strides = [1, 1]} : vector<120x8xf32> to vector<8x8xf32>
    %126 = vector.broadcast %0 : vector<1x8xf32> to vector<8x8xf32>
    %127 = arith.addf %125, %126 : vector<8x8xf32>
    %128 = arith.truncf %127 : vector<8x8xf32> to vector<8x8xbf16>
    %c0_86 = arith.constant 0 : index
    %c56_87 = arith.constant 56 : index
    %c0_88 = arith.constant 0 : index
    %129 = vector.load %arg4[%c0_86, %c56_87, %c0_88] : memref<1x64x8xbf16, #tpu.memory_space<vmem>>, vector<1x8x8xbf16>
    %130 = vector.shape_cast %129 : vector<1x8x8xbf16> to vector<8x8xbf16>
    %131 = vector.shape_cast %128 : vector<8x8xbf16> to vector<1x8x8xbf16>
    tpu.vector_store %arg4[%c0_86, %c56_87, %c0_88], %131 {strides = array<i32>} : memref<1x64x8xbf16, #tpu.memory_space<vmem>>, vector<1x8x8xbf16>,
    return
  }
  func.func @transform_0(%arg0: i32) -> (i32, i32, i32) {
    %c0_i32 = arith.constant 0 : i32
    %c0_i32_0 = arith.constant 0 : i32
    %c0_i32_1 = arith.constant 0 : i32
    return %arg0, %c0_i32, %c0_i32_0 : i32, i32, i32
  }
  func.func @transform_1(%arg0: i32) -> (i32, i32, i32) {
    %c0_i32 = arith.constant 0 : i32
    %c0_i32_0 = arith.constant 0 : i32
    %c0_i32_1 = arith.constant 0 : i32
    %c0_i32_2 = arith.constant 0 : i32
    return %c0_i32, %c0_i32_0, %c0_i32_1 : i32, i32, i32
  }
  func.func @transform_2(%arg0: i32) -> (i32, i32) {
    %c0_i32 = arith.constant 0 : i32
    %c0_i32_0 = arith.constant 0 : i32
    %c0_i32_1 = arith.constant 0 : i32
    return %c0_i32, %c0_i32_0 : i32, i32
  }
  func.func @transform_3(%arg0: i32) -> (i32, i32, i32) {
    %c0_i32 = arith.constant 0 : i32
    %c0_i32_0 = arith.constant 0 : i32
    %c0_i32_1 = arith.constant 0 : i32
    return %arg0, %c0_i32, %c0_i32_0 : i32, i32, i32
  }
}

</mosaic_0001>

<bundles_post_ra>
// kernel: tpu_custom_call.1
= control target key start
LH: loop header
LB: loop body
LE: loop exit
PB: predicated region body
PF: predicated region fallthrough
CT: control target
= control target key end

     0   :  { %s2699_s12 = smov 0   ;;  %s3210_s0 = inlined_call_operand.vmem [shape: bf16[2,64,8], index: 0, kind: input, shape index: {}]   ;;  %s3211_s1 = inlined_call_operand.vmem [shape: bf16[9,8,8], index: 1, kind: input, shape index: {}]   ;;  %s3212_s2 = inlined_call_operand.vmem [shape: f32[1,8], index: 2, kind: input, shape index: {}]   ;;  %s3213_s3 = inlined_call_operand.vmem [shape: bf16[2,64,8], index: 3, kind: output, shape index: {}]  }
   0x1 LB: > { %s2171_s13 = sadd.s32 4294967295, %s2676_s12   ;;  %p2175_p0 = scmp.ge.s32.totalorder %s2676_s12, 1  ;;  %s2676_s12 = sphi %s2699_s12, %s13_s12  }
   0x2   : > { %p137_p1 = scmp.lt.s32.totalorder %s2676_s12, 3 }
   0x4   : > { %p138_p2 = pnand %p2175_p0, %p137_p1 }
   0x5   : > { %p2712_p3 = scmp.lt.s32.totalorder (!%p138_p2), %s2171_s13, 1 }
   0x6   : > { %141 = sbr.rel (%p138_p2) target bundleno = 372 (0x174), region = 32 }
   0xb   : > { %v2180_v0 = vld [vmem:[%s3211_s1 + $0x4] sm:$0xf]  ;;  %vm285_vm0 = vcmask 1043456   ;;  %vm181_vm1 = vcmask 60416   ;;  %v2678_v2 = vmov 0   ;;  %s3216_s13 = smov (!%p2712_p3, %s2171_s13), 1 }
   0xc   : > { %2582 = vmatprep.subr.msk.bf16.mxu0 %vm285_vm0, %v2180_v0  ;;  %2583 = vmatprep.subr.msk.bf16.mxu1 %vm285_vm0, %v2180_v0  ;;  %v287_v1 = vsel %vm285_vm0, %v2180_v0, 0  ;;  %182 = vst.msk [vmem:[#allocation2] sm:$0xf] %vm181_vm1, %v2678_v2  ;;  %183 = vst.msk [vmem:[#allocation2 + $0x4] sm:$0xf] %vm181_vm1, %v2678_v2  ;;  %s2335_s21 = sshll.u32 %s3216_s13, 5 }
   0xd   : > { %184 = vst.msk [vmem:[#allocation2 + $0x8] sm:$0xf] %vm181_vm1, %v2678_v2  ;;  %188 = vst.msk [vmem:[#allocation2 + $0x10] sm:$0xf] %vm181_vm1, %v2678_v2  ;;  %v219_v3 = vld [vmem:[%s3211_s1] sm:$0xf]  ;;  %2419 = vmatpush3.bf16.msra.mxu0 %v287_v1  ;;  %2581 = vmatpush3.bf16.msra.mxu1 %v287_v1  ;;  %s2752_s24 = scalar_lea.vmem %s3210_s0, %s2335_s21  ;;  %s3164_s16 = scalar_lea.vmem %s3213_s3, %s2335_s21 }
   0xe   : > { %185 = vst.msk [vmem:[#allocation2 + $0x4c] sm:$0xf] %vm181_vm1, %v2678_v2  ;;  %186 = vst.msk [vmem:[#allocation2 + $0x50] sm:$0xf] %vm181_vm1, %v2678_v2  ;;  %v2213_v4 = vld [vmem:[%s3211_s1 + $0x8] sm:$0xf]  ;;  %2584 = vmatprep.subr.msk.bf16.mxu1 %vm285_vm0, %v219_v3 }
   0xf   : > { %190 = vst.msk [vmem:[#allocation2 + $0x18] sm:$0xf] %vm181_vm1, %v2678_v2  ;;  %192 = vst.msk [vmem:[#allocation2 + $0x20] sm:$0xf] %vm181_vm1, %v2678_v2  ;;  %2585 = vmatprep.subr.msk.bf16.mxu0 %vm285_vm0, %v2213_v4  ;;  %vm260_vm2 = vcmask 64512   ;;  %v485_v16 = vsel %vm285_vm0, %v219_v3, 0 }
  0x10   : > { %194 = vst.msk [vmem:[#allocation2 + $0x28] sm:$0xf] %vm181_vm1, %v2678_v2  ;;  %196 = vst.msk [vmem:[#allocation2 + $0x30] sm:$0xf] %vm181_vm1, %v2678_v2  ;;  %v173_v5 = vld [vmem:[%s2752_s24] sm:$0xf] }
  0x11   : > { %198 = vst.msk [vmem:[#allocation2 + $0x38] sm:$0xf] %vm181_vm1, %v2678_v2  ;;  %200 = vst.msk [vmem:[#allocation2 + $0x40] sm:$0xf] %vm181_vm1, %v2678_v2  ;;  %v174_v6 = vld [vmem:[%s2752_s24 + $0x4] sm:$0xf] }
  0x12   : > { %202 = vst.msk [vmem:[#allocation2 + $0x48] sm:$0xf] %vm181_vm1, %v2678_v2  ;;  %v175_v7 = vld [vmem:[%s2752_s24 + $0x8] sm:$0xf]  ;;  %187 = vst.msk [vmem:[#allocation2 + $0xc] sm:$0xf] %vm181_vm1, %v173_v5 }
  0x13   : > { %189 = vst.msk [vmem:[#allocation2 + $0x14] sm:$0xf] %vm181_vm1, %v174_v6  ;;  %v176_v8 = vld [vmem:[%s2752_s24 + $0xc] sm:$0xf]  ;;  %v177_v9 = vld [vmem:[%s2752_s24 + $0x10] sm:$0xf] }
  0x14   : > { %v178_v10 = vld [vmem:[%s2752_s24 + $0x14] sm:$0xf]  ;;  %191 = vst.msk [vmem:[#allocation2 + $0x1c] sm:$0xf] %vm181_vm1, %v175_v7  ;;  %v203_v11 = vld [vmem:[#allocation2] sm:$0x8] }
  0x15   : > { %v204_v12 = vld [vmem:[#allocation2 + $0x4] sm:$0xf]  ;;  %v205_v13 = vld [vmem:[#allocation2 + $0x8] sm:$0xf]  ;;  %193 = vst.msk [vmem:[#allocation2 + $0x24] sm:$0xf] %vm181_vm1, %v176_v8 }
  0x16   : > { %195 = vst.msk [vmem:[#allocation2 + $0x2c] sm:$0xf] %vm181_vm1, %v177_v9  ;;  %197 = vst.msk [vmem:[#allocation2 + $0x34] sm:$0xf] %vm181_vm1, %v178_v10  ;;  %v2181_v14 = vcombine.low %v204_v12, %v205_v13  ;;  %v2197_v15 = vcombine.low %v203_v11, %v204_v12  ;;  %v207_v17 = vld [vmem:[#allocation2 + $0x10] sm:$0xf] }
  0x17   : > { %v179_v18 = vld [vmem:[%s2752_s24 + $0x18] sm:$0xf]  ;;  %v213_v19 = vld [vmem:[#allocation2 + $0x28] sm:$0xf]  ;;  %v2770_v20 = vld [vmem:[#allocation2 + $0x30] sm:$0xf] }
  0x18   : > { %2420 = vmatprep.mubr.msk.bf16.mxu0 %vm260_vm2, %v2181_v14  ;;  %199 = vst.msk [vmem:[#allocation2 + $0x3c] sm:$0xf] %vm181_vm1, %v179_v18  ;;  %v390_v23 = vshrl.u32 %v2197_v15, 16  ;;  %v209_v24 = vld [vmem:[#allocation2 + $0x18] sm:$0xf]  ;;  %v723_v25 = vsel %vm285_vm0, %v2213_v4, 0 }
  0x19   : > { %v206_v21 = vld [vmem:[#allocation2 + $0xc] sm:$0xf]  ;;  %v2776_v26 = vld [vmem:[%s3211_s1 + $0x10] sm:$0xf]  ;;  %v393_v30 = vshll.u32 %v2197_v15, 16  ;;  %v2615_v47 = vld [vmem:[#allocation2 + $0x4] sm:$0xff]  }
  0x1a   : > { %v208_v22 = vld [vmem:[#allocation2 + $0x14] sm:$0xf]  ;;  %v2182_v27 = vcombine.low %v206_v21, %v207_v17  ;;  %v2198_v28 = vcombine.low %v205_v13, %v206_v21  ;;  %vm388_vm3 = vsmask.f32 4352  ;;  %v211_v38 = vld [vmem:[#allocation2 + $0x20] sm:$0xf] }
  0x1b   : > { %v2199_v29 = vcombine.low %v207_v17, %v208_v22  ;;  %v210_v33 = vld [vmem:[#allocation2 + $0x1c] sm:$0xf]  ;;  %v2783_v40 = vld [vmem:[%s3211_s1 + $0xc] sm:$0xf]  ;;  %v2788_v44 = vld [vmem:[#allocation2 + $0x38] sm:$0xf]  ;;  %v2183_v57 = vcombine.low %v208_v22, %v209_v24 }
  0x1c   : > { %v212_v31 = vld [vmem:[#allocation2 + $0x24] sm:$0xf]  ;;  %v398_v36 = vshrl.u32 %v2198_v28, 16  ;;  %v401_v37 = vshll.u32 %v2198_v28, 16  ;;  %2421 = vmatmul.mubr.msk.bf16.vlgmr.msra.gmra.mxu0 %vm260_vm2, %v2182_v27  ;;  %v2200_v39 = vcombine.low %v209_v24, %v210_v33  ;;  %v392_v45 = vrot.slane %v390_v23, 3  ;;  %v2616_v48 = vld [vmem:[#allocation2 + $0xc] sm:$0xff]  }
  0x1d   : > { %v214_v32 = vld [vmem:[#allocation2 + $0x2c] sm:$0xf]  ;;  %v2185_v34 = vcombine.low %v212_v31, %v213_v19  ;;  %v407_v41 = vshrl.u32 %v2199_v29, 16  ;;  %v410_v42 = vshll.u32 %v2199_v29, 16  ;;  %v2786_v43 = vcombine.low %v211_v38, %v212_v31  ;;  %2455 = vmatpush3.bf16.msra.mxu0 %v723_v25  ;;  %v2790_v46 = vld [vmem:[#allocation2 + $0x34] sm:$0xf]  ;;  %2424 = vmatprep.mubr.msk.bf16.mxu0 %vm260_vm2, %v2183_v57 }
  0x1e   : > { %v2186_v35 = vcombine.low %v214_v32, %v2770_v20  ;;  %vm634_vm4 = vsmask.f32 7424  ;;  %2587 = vmatprep.subr.msk.bf16.mxu0 %vm285_vm0, %v2776_v26  ;;  %v395_v49 = vrot.slane %v393_v30, 4  ;;  %v2184_v50 = vcombine.low %v210_v33, %v211_v38  ;;  %v2617_v53 = vld [vmem:[#allocation2 + $0x14] sm:$0xff]   ;;  %v2797_v58 = vld [vmem:[#allocation2 + $0x1c] sm:$0xff]   ;;  %v2619_v11 = vld [vmem:[#allocation2 + $0x24] sm:$0xff]  }
  0x1f   : > { %2428 = vmatprep.mubr.msk.bf16.mxu1 %vm260_vm2, %v2185_v34  ;;  %v2202_v51 = vcombine.low %v213_v19, %v214_v32  ;;  %v218_v52 = vld [vmem:[#allocation2 + $0x3c] sm:$0xf]  ;;  %v400_v54 = vrot.slane %v398_v36, 3  ;;  %v403_v55 = vrot.slane %v401_v37, 4  ;;  %v416_v56 = vshrl.u32 %v2200_v39, 16  ;;  %v2809_v21 = vld [vmem:[#allocation2 + $0x2c] sm:$0xff]  }
  0x20   : > { %2429 = vmatmul.mubr.msk.bf16.vlgmr.msra.gmra.mxu1 %vm260_vm2, %v2186_v35  ;;  %v409_v59 = vrot.slane %v407_v41, 3  ;;  %v412_v60 = vrot.slane %v410_v42, 4  ;;  %v419_v61 = vshll.u32 %v2200_v39, 16  ;;  %v425_v62 = vshrl.u32 %v2786_v43, 16  ;;  %v822_v57 = vld [vmem:[#allocation2 + $0x8] sm:$0x8] }
  0x21   : > { %2437 = vmatpush3.bf16.msra.mxu1 %v485_v16  ;;  %v428_v63 = vshll.u32 %v2786_v43, 16  ;;  %v2187_v0 = vcombine.low %v2790_v46, %v2788_v44  ;;  %v2188_v1 = vcombine.low %v218_v52, %v218_v52  ;;  %v636_v2 = vshrl.u32 %v2615_v47, 16  ;;  %v2826_v43 = vld [vmem:[%s3211_s1 + $0x18] sm:$0xf] }
  0x22   : > { %2586 = vmatprep.subr.msk.bf16.mxu1 %vm285_vm0, %v2783_v40  ;;  %v638_v3 = vshll.u32 %v2615_v47, 16  ;;  %v643_v4 = vshll.u32 %v2616_v48, 16  ;;  %v647_v5 = vshrl.u32 %v2616_v48, 16  ;;  %v396_v6 = vor.u32 %v395_v49, %v392_v45 }
  0x23   : > { %2432 = vmatprep.mubr.msk.bf16.mxu1 %vm260_vm2, %v2187_v0  ;;  %v404_v7 = vor.u32 %v403_v55, %v400_v54  ;;  %v651_v8 = vshll.u32 %v2617_v53, 16  ;;  %v655_v9 = vshrl.u32 %v2617_v53, 16  ;;  %v659_v10 = vshll.u32 %v2797_v58, 16  ;;  %v2853_v0 = vld [vmem:[#allocation2 + $0x10] sm:$0xf] }
  0x24   : > { %2425 = vmatmul.mubr.msk.bf16.gmra.mxu0 %vm260_vm2, %v2184_v50  ;;  %v640_v12 = vrot.slane %v638_v3, 1  ;;  %v645_v13 = vrot.slane %v643_v4, 1  ;;  %v418_v14 = vrot.slane %v416_v56, 3  ;;  %v421_v15 = vrot.slane %v419_v61, 4  ;;  %v2837_v50 = vld [vmem:[%s3211_s1 + $0x14] sm:$0xf] }
  0x25   : > { %v434_v16 = vshrl.u32 %v2202_v51, 16  ;;  %v405_v17 = vsel %vm388_vm3, %v396_v6, %v404_v7  ;;  %v653_v18 = vrot.slane %v651_v8, 1  ;;  %v661_v19 = vrot.slane %v659_v10, 1  ;;  %v2847_v61 = vld [vmem:[#allocation2 + $0xc] sm:$0xf] }
  0x26   : > { %v413_v22 = vor.u32 %v412_v60, %v409_v59  ;;  %v437_v23 = vshll.u32 %v2202_v51, 16  ;;  %v641_v24 = vor.u32 %v640_v12, %v636_v2  ;;  %v649_v25 = vor.u32 %v647_v5, %v645_v13  ;;  %v180_v51 = vld [vmem:[%s2752_s24 + $0x1c] sm:$0xf] }
  0x27   : > { %v1110_v27 = vsel %vm285_vm0, %v2776_v26, 0  ;;  %v657_v28 = vor.u32 %v655_v9, %v653_v18  ;;  %v422_v29 = vor.u32 %v421_v15, %v418_v14  ;;  %v667_v30 = vshll.u32 %v2619_v11, 16  ;;  %201 = vst.msk [vmem:[#allocation2 + $0x44] sm:$0xf] %vm181_vm1, %v180_v51  ;;  %v2893_v51 = vld [vmem:[#allocation2 + $0x30] sm:$0xf] }
  0x28   : > { %2433 = vmatmul.mubr.msk.bf16.gmra.mxu1 %vm260_vm2, %v2188_v1  ;;  %v427_v31 = vrot.slane %v425_v62, 3  ;;  %v646_v32 = vsel %vm634_vm4, %v641_v24, %v645_v13  ;;  %v654_v33 = vsel %vm634_vm4, %v649_v25, %v653_v18  ;;  %v663_v34 = vshrl.u32 %v2797_v58, 16  ;;  %v2855_v1 = vld [vmem:[#allocation2 + $0x14] sm:$0xf]  ;;  %v2869_v18 = vld [vmem:[#allocation2 + $0x1c] sm:$0xf] }
  0x29   : > { %2438 = vmatprep.mubr.msk.bf16.mxu1 %vm260_vm2, %v405_v17  ;;  %v430_v35 = vrot.slane %v428_v63, 4  ;;  %2456 = vmatprep.mubr.msk.bf16.mxu0 %vm260_vm2, %v646_v32  ;;  %v662_v36 = vsel %vm634_vm4, %v657_v28, %v661_v19  ;;  %v671_v37 = vshrl.u32 %v2619_v11, 16  ;;  %v675_v38 = vshll.u32 %v2809_v21, 16  ;;  %v2867_v17 = vld [vmem:[#allocation2 + $0x18] sm:$0xf] }
  0x2a   : > { %v2203_v26 = vcombine.low %v2770_v20, %v2790_v46  ;;  %v436_v39 = vrot.slane %v434_v16, 3  ;;  %v439_v41 = vrot.slane %v437_v23, 4  ;;  %v414_v42 = vsel %vm388_vm3, %v404_v7, %v413_v22  ;;  %v2621_v20 = vld [vmem:[#allocation2 + $0x34] sm:$0xff]   ;;  %v2874_v28 = vld [vmem:[#allocation2 + $0x24] sm:$0xf] }
  0x2b   : > { %v2204_v45 = vcombine.low %v2788_v44, %v218_v52  ;;  %v976_v47 = vsel %vm285_vm0, %v2783_v40, 0  ;;  %v423_v48 = vsel %vm388_vm3, %v413_v22, %v422_v29  ;;  %v669_v49 = vrot.slane %v667_v30, 1  ;;  %v2841_v40 = vld [vmem:[#allocation2 + $0x3c] sm:$0x1f]  }
  0x2c   : > { %2457 = vmatmul.mubr.msk.bf16.vlgmr.msra.gmra.mxu0 %vm260_vm2, %v654_v33  ;;  %v665_v46 = vor.u32 %v663_v34, %v661_v19  ;;  %v431_v44 = vor.u32 %v430_v35, %v427_v31  ;;  %v677_v53 = vrot.slane %v675_v38, 1  ;;  %v443_v54 = vshrl.u32 %v2203_v26, 16  ;;  %v2872_v22 = vld [vmem:[#allocation2 + $0x20] sm:$0xf] }
  0x2d   : > { %2491 = vmatpush3.bf16.msra.mxu0 %v1110_v27  ;;  %2460 = vmatprep.mubr.msk.bf16.mxu0 %vm260_vm2, %v662_v36  ;;  %v673_v52 = vor.u32 %v671_v37, %v669_v49  ;;  %v446_v55 = vshll.u32 %v2203_v26, 16  ;;  %v440_v56 = vor.u32 %v439_v41, %v436_v39  ;;  %v683_v58 = vshll.u32 %v2621_v20, 16  ;;  %v2888_v39 = vld [vmem:[#allocation2 + $0x28] sm:$0xf] }
  0x2e   : > { %2589 = vmatprep.subr.msk.bf16.mxu0 %vm285_vm0, %v2826_v43  ;;  %v452_v59 = vshrl.u32 %v2204_v45, 16  ;;  %v455_v60 = vshll.u32 %v2204_v45, 16  ;;  %v670_v62 = vsel %vm634_vm4, %v665_v46, %v669_v49  ;;  %v679_v63 = vshrl.u32 %v2809_v21, 16 }
  0x2f   : > { %v432_v2 = vsel %vm388_vm3, %v422_v29, %v431_v44  ;;  %v678_v3 = vsel %vm634_vm4, %v673_v52, %v677_v53  ;;  %v687_v4 = vshrl.u32 %v2621_v20, 16  ;;  %v691_v5 = vshll.u32 %v2841_v40, 16  ;;  %v2897_v52 = vld [vmem:[#allocation2 + $0x34] sm:$0xf] }
  0x30   : > { %2439 = vmatmul.mubr.msk.bf16.vlgmr.msra.gmra.mxu1 %vm260_vm2, %v414_v42  ;;  %v441_v6 = vsel %vm388_vm3, %v431_v44, %v440_v56  ;;  %v445_v7 = vrot.slane %v443_v54, 3  ;;  %v448_v8 = vrot.slane %v446_v55, 4  ;;  %v2231_v9 = vcombine.low %v822_v57, %v2847_v61 }
  0x31   : > { %2473 = vmatpush3.bf16.msra.mxu1 %v976_v47  ;;  %2442 = vmatprep.mubr.msk.bf16.mxu1 %vm260_vm2, %v423_v48  ;;  %v685_v10 = vrot.slane %v683_v58, 1  ;;  %v454_v11 = vrot.slane %v452_v59, 3  ;;  %v457_v12 = vrot.slane %v455_v60, 4  ;;  %v2232_v13 = vcombine.low %v2853_v0, %v2855_v1  ;;  %v2891_v47 = vld [vmem:[#allocation2 + $0x2c] sm:$0xf] }
  0x32   : > { %2588 = vmatprep.subr.msk.bf16.mxu1 %vm285_vm0, %v2837_v50  ;;  %v681_v14 = vor.u32 %v679_v63, %v677_v53  ;;  %v693_v16 = vrot.slane %v691_v5, 1  ;;  %v449_v19 = vor.u32 %v448_v8, %v445_v7  ;;  %v881_v21 = vshrl.u32 %v2231_v9, 16 }
  0x33   : > { %v689_v15 = vor.u32 %v687_v4, %v685_v10  ;;  %v458_v23 = vor.u32 %v457_v12, %v454_v11  ;;  %v884_v24 = vshll.u32 %v2231_v9, 16  ;;  %v889_v25 = vshrl.u32 %v2232_v13, 16 }
  0x34   : > { %2461 = vmatmul.mubr.msk.bf16.gmra.mxu0 %vm260_vm2, %v670_v62  ;;  %v892_v27 = vshll.u32 %v2232_v13, 16  ;;  %v686_v29 = vsel %vm634_vm4, %v681_v14, %v685_v10  ;;  %v695_v31 = vshrl.u32 %v2841_v40, 16  ;;  %v450_v32 = vsel %vm388_vm3, %v440_v56, %v449_v19  ;;  %v2909_v62 = vld [vmem:[#allocation2 + $0x3c] sm:$0xf] }
  0x35   : > { %2464 = vmatprep.mubr.msk.bf16.mxu0 %vm260_vm2, %v678_v3  ;;  %v694_v30 = vsel %vm634_vm4, %v689_v15, %v693_v16  ;;  %v2233_v33 = vcombine.low %v2867_v17, %v2869_v18  ;;  %v883_v34 = vrot.slane %v881_v21, 3  ;;  %v2234_v35 = vcombine.low %v2872_v22, %v2874_v28  ;;  %v2945_v21 = vld [vmem:[#allocation2 + $0x18] sm:$0xf] }
  0x36   : > { %v459_v36 = vsel %vm388_vm3, %v449_v19, %v458_v23  ;;  %v886_v37 = vrot.slane %v884_v24, 4  ;;  %v891_v38 = vrot.slane %v889_v25, 3  ;;  %v894_v26 = vrot.slane %v892_v27, 4  ;;  %v2943_v19 = vld [vmem:[#allocation2 + $0x14] sm:$0xf] }
  0x37   : > { %v697_v41 = vor.u32 %v695_v31, %v693_v16  ;;  %v898_v42 = vshrl.u32 %v2233_v33, 16  ;;  %v901_v45 = vshll.u32 %v2233_v33, 16  ;;  %v907_v20 = vshrl.u32 %v2234_v35, 16  ;;  %v2950_v27 = vld [vmem:[#allocation2 + $0x1c] sm:$0xf] }
  0x38   : > { %2443 = vmatmul.mubr.msk.bf16.gmra.mxu1 %vm260_vm2, %v432_v2  ;;  %v887_v48 = vor.u32 %v886_v37, %v883_v34  ;;  %v895_v49 = vor.u32 %v894_v26, %v891_v38  ;;  %v910_v46 = vshll.u32 %v2234_v35, 16  ;;  %v2248_v44 = vcombine.low %v2847_v61, %v2853_v0  ;;  %v2907_v61 = vld [vmem:[#allocation2 + $0x38] sm:$0xf]  ;;  %v2912_v0 = vld [vmem:[#allocation2 + $0x40] sm:$0xf]  ;;  %v2642_v26 = vld [vmem:[#allocation2 + $0xc] sm:$0xff]  }
  0x39   : > { %2446 = vmatprep.mubr.msk.bf16.mxu1 %vm260_vm2, %v441_v6  ;;  %v2235_v53 = vcombine.low %v2888_v39, %v2891_v47  ;;  %v900_v40 = vrot.slane %v898_v42, 3  ;;  %v903_v54 = vrot.slane %v901_v45, 4  ;;  %v909_v56 = vrot.slane %v907_v20, 3  ;;  %v2916_v6 = vld [vmem:[#allocation2 + $0x44] sm:$0xf] }
  0x3a   : > { %v896_v55 = vsel %vm388_vm3, %v887_v48, %v895_v49  ;;  %v912_v57 = vrot.slane %v910_v46, 4  ;;  %v2236_v58 = vcombine.low %v2893_v51, %v2897_v52  ;;  %v2249_v2 = vcombine.low %v2855_v1, %v2867_v17  ;;  %v2940_v17 = vld [vmem:[%s3211_s1 + $0x1c] sm:$0xf]  ;;  %v2971_v46 = vld [vmem:[#allocation2 + $0x28] sm:$0xf] }
  0x3b   : > { %v916_v59 = vshrl.u32 %v2235_v53, 16  ;;  %v919_v60 = vshll.u32 %v2235_v53, 16  ;;  %v904_v63 = vor.u32 %v903_v54, %v900_v40  ;;  %v1608_v7 = vsel %vm285_vm0, %v2826_v43, 0  ;;  %v2932_v43 = vld [vmem:[%s3211_s1 + $0x20] sm:$0xf]  ;;  %v2643_v40 = vld [vmem:[#allocation2 + $0x14] sm:$0xff]  }
  0x3c   : > { %2465 = vmatmul.mubr.msk.bf16.gmra.mxu0 %vm260_vm2, %v686_v29  ;;  %v913_v3 = vor.u32 %v912_v57, %v909_v56  ;;  %v925_v4 = vshrl.u32 %v2236_v58, 16  ;;  %v928_v5 = vshll.u32 %v2236_v58, 16  ;;  %v2250_v8 = vcombine.low %v2869_v18, %v2872_v22 }
  0x3d   : > { %2468 = vmatprep.mubr.msk.bf16.mxu0 %vm260_vm2, %v694_v30  ;;  %v918_v9 = vrot.slane %v916_v59, 3  ;;  %v921_v10 = vrot.slane %v919_v60, 4  ;;  %v905_v11 = vsel %vm388_vm3, %v895_v49, %v904_v63  ;;  %v1355_v12 = vsel %vm285_vm0, %v2837_v50, 0  ;;  %v1454_v50 = vld [vmem:[#allocation2 + $0x10] sm:$0x8] }
  0x3e   : > { %v2237_v1 = vcombine.low %v2907_v61, %v2909_v62  ;;  %v2238_v13 = vcombine.low %v2912_v0, %v2916_v6  ;;  %v914_v14 = vsel %vm388_vm3, %v904_v63, %v913_v3  ;;  %v927_v15 = vrot.slane %v925_v4, 3 }
  0x3f   : > { %v930_v16 = vrot.slane %v928_v5, 4  ;;  %v922_v18 = vor.u32 %v921_v10, %v918_v9  ;;  %v2251_v29 = vcombine.low %v2874_v28, %v2888_v39  ;;  %v2252_v31 = vcombine.low %v2891_v47, %v2893_v51  ;;  %v2965_v39 = vld [vmem:[#allocation2 + $0x20] sm:$0xf]  ;;  %v2973_v51 = vld [vmem:[#allocation2 + $0x2c] sm:$0xf] }
  0x40   : > { %2447 = vmatmul.mubr.msk.bf16.gmra.mxu1 %vm260_vm2, %v450_v32  ;;  %v934_v22 = vshrl.u32 %v2237_v1, 16  ;;  %v943_v24 = vshrl.u32 %v2238_v13, 16  ;;  %v946_v25 = vshll.u32 %v2238_v13, 16  ;;  %v2282_v32 = vcombine.low %v1454_v50, %v2943_v19  ;;  %v2988_v10 = vld [vmem:[#allocation2 + $0x30] sm:$0xf] }
  0x41   : > { %2450 = vmatprep.mubr.msk.bf16.mxu1 %vm260_vm2, %v459_v36  ;;  %v931_v30 = vor.u32 %v930_v16, %v927_v15  ;;  %v923_v33 = vsel %vm388_vm3, %v913_v3, %v922_v18  ;;  %v2283_v34 = vcombine.low %v2945_v21, %v2950_v27  ;;  %v1270_v54 = vshll.u32 %v2642_v26, 16  ;;  %v2997_v13 = vld [vmem:[#allocation2 + $0x3c] sm:$0xf] }
  0x42   : > { %v936_v35 = vrot.slane %v934_v22, 3  ;;  %v945_v37 = vrot.slane %v943_v24, 3  ;;  %v948_v38 = vrot.slane %v946_v25, 4  ;;  %v1513_v42 = vshrl.u32 %v2282_v32, 16 }
  0x43   : > { %v932_v28 = vsel %vm388_vm3, %v922_v18, %v931_v30  ;;  %v1516_v45 = vshll.u32 %v2282_v32, 16  ;;  %v1521_v47 = vshrl.u32 %v2283_v34, 16  ;;  %v1524_v48 = vshll.u32 %v2283_v34, 16  ;;  %v2646_v18 = vld [vmem:[#allocation2 + $0x24] sm:$0xff]  }
  0x44   : > { %2469 = vmatmul.mubr.msk.bf16.gmra.mxu0 %vm260_vm2, %v697_v41  ;;  %v2967_v41 = vld [vmem:[#allocation2 + $0x24] sm:$0xf]  ;;  %v949_v20 = vor.u32 %v948_v38, %v945_v37  ;;  %v1515_v56 = vrot.slane %v1513_v42, 3  ;;  %v2285_v60 = vcombine.low %v2971_v46, %v2973_v51  ;;  %v1275_v3 = vshll.u32 %v2643_v40, 16  ;;  %v2648_v37 = vld [vmem:[#allocation2 + $0x2c] sm:$0xff]  }
  0x45   : > { %2492 = vmatprep.mubr.msk.bf16.mxu0 %vm260_vm2, %v2248_v44  ;;  %v2253_v44 = vcombine.low %v2897_v52, %v2907_v61  ;;  %v2284_v53 = vcombine.low %v2965_v39, %v2967_v41  ;;  %v1518_v57 = vrot.slane %v1516_v45, 4  ;;  %v1523_v58 = vrot.slane %v1521_v47, 3  ;;  %v3007_v38 = vld [vmem:[#allocation2 + $0x40] sm:$0xf]  ;;  %v3010_v47 = vld [vmem:[#allocation2 + $0x44] sm:$0xf] }
  0x46   : > { %v1526_v59 = vrot.slane %v1524_v48, 4  ;;  %v1268_v52 = vshrl.u32 %v2642_v26, 16  ;;  %v1272_v61 = vrot.slane %v1270_v54, 1  ;;  %v1542_v9 = vshll.u32 %v2285_v60, 16 }
  0x47   : > { %v1530_v4 = vshrl.u32 %v2284_v53, 16  ;;  %v1533_v5 = vshll.u32 %v2284_v53, 16  ;;  %v1277_v15 = vrot.slane %v1275_v3, 1  ;;  %v1291_v34 = vshll.u32 %v2646_v18, 16 }
  0x48   : > { %2451 = vmatmul.mubr.msk.bf16.gmra.mxu1 %vm260_vm2, %v458_v23  ;;  %v937_v23 = vshll.u32 %v2237_v1, 16  ;;  %v2995_v1 = vld [vmem:[#allocation2 + $0x38] sm:$0xf]  ;;  %v1295_v3 = vshrl.u32 %v2646_v18, 16 }
  0x49   : > { %2474 = vmatprep.mubr.msk.bf16.mxu1 %vm260_vm2, %v896_v55  ;;  %v2254_v55 = vcombine.low %v2909_v62, %v2912_v0  ;;  %v2644_v62 = vld [vmem:[#allocation2 + $0x1c] sm:$0xff]   ;;  %v1519_v0 = vor.u32 %v1518_v57, %v1515_v56  ;;  %v1532_v16 = vrot.slane %v1530_v4, 3  ;;  %v1535_v50 = vrot.slane %v1533_v5, 4 }
  0x4a   : > { %v939_v36 = vrot.slane %v937_v23, 4  ;;  %v1283_v22 = vshll.u32 %v2644_v62, 16  ;;  %v1303_v5 = vshrl.u32 %v2648_v37, 16 }
  0x4b   : > { %v1536_v32 = vor.u32 %v1535_v50, %v1532_v16 }
  0x4c   : > { %2493 = vmatmul.mubr.msk.bf16.vlgmr.msra.gmra.mxu0 %vm260_vm2, %v2249_v2  ;;  %v940_v49 = vor.u32 %v939_v36, %v936_v35 }
  0x4d   : > { %2527 = vmatpush3.bf16.msra.mxu0 %v1608_v7  ;;  %2496 = vmatprep.mubr.msk.bf16.mxu0 %vm260_vm2, %v2250_v8  ;;  %v1527_v7 = vor.u32 %v1526_v59, %v1523_v58  ;;  %v1539_v8 = vshrl.u32 %v2285_v60, 16  ;;  %v1299_v58 = vshll.u32 %v2648_v37, 16  ;;  %v2288_v59 = vcombine.low %v3007_v38, %v3010_v47 }
  0x4e   : > { %2591 = vmatprep.subr.msk.bf16.mxu0 %vm285_vm0, %v2932_v43  ;;  %v941_v63 = vsel %vm388_vm3, %v931_v30, %v940_v49  ;;  %v950_v2 = vsel %vm388_vm3, %v940_v49, %v949_v20  ;;  %v1279_v30 = vshrl.u32 %v2643_v40, 16  ;;  %v3013_v49 = vld [vmem:[#allocation2 + $0x48] sm:$0xf]  ;;  %v1987_v40 = vsel %vm285_vm0, %v2932_v43, 0 }
  0x4f   : > { %v1528_v24 = vsel %vm388_vm3, %v1519_v0, %v1527_v7  ;;  %v1541_v25 = vrot.slane %v1539_v8, 3  ;;  %v1537_v53 = vsel %vm388_vm3, %v1527_v7, %v1536_v32  ;;  %v1742_v43 = vsel %vm285_vm0, %v2940_v17, 0 }
  0x50   : > { %2475 = vmatmul.mubr.msk.bf16.vlgmr.msra.gmra.mxu1 %vm260_vm2, %v905_v11  ;;  %v2990_v11 = vld [vmem:[#allocation2 + $0x34] sm:$0xf]  ;;  %v1281_v48 = vor.u32 %v1279_v30, %v1277_v15  ;;  %v1566_v7 = vshrl.u32 %v2288_v59, 16  ;;  %v1569_v8 = vshll.u32 %v2288_v59, 16 }
  0x51   : > { %2509 = vmatpush3.bf16.msra.mxu1 %v1355_v12  ;;  %2478 = vmatprep.mubr.msk.bf16.mxu1 %vm260_vm2, %v914_v14  ;;  %v2255_v12 = vcombine.low %v2916_v6, %v2916_v6  ;;  %v1273_v14 = vor.u32 %v1272_v61, %v1268_v52  ;;  %v2286_v23 = vcombine.low %v2988_v10, %v2990_v11 }
  0x52   : > { %2590 = vmatprep.subr.msk.bf16.mxu1 %vm285_vm0, %v2940_v17  ;;  %v2287_v6 = vcombine.low %v2995_v1, %v2997_v13 }
  0x53   : > { %v1548_v35 = vshrl.u32 %v2286_v23, 16  ;;  %v1551_v36 = vshll.u32 %v2286_v23, 16 }
  0x54   : > { %2497 = vmatmul.mubr.msk.bf16.gmra.mxu0 %vm260_vm2, %v2251_v29  ;;  %v1544_v29 = vrot.slane %v1542_v9, 4  ;;  %v1557_v42 = vshrl.u32 %v2287_v6, 16  ;;  %v1560_v45 = vshll.u32 %v2287_v6, 16  ;;  %v1301_v9 = vrot.slane %v1299_v58, 1 }
  0x55   : > { %2500 = vmatprep.mubr.msk.bf16.mxu0 %vm260_vm2, %v2252_v31  ;;  %v1278_v31 = vsel %vm634_vm4, %v1273_v14, %v1277_v15  ;;  %v1550_v56 = vrot.slane %v1548_v35, 3  ;;  %v1553_v57 = vrot.slane %v1551_v36, 4  ;;  %v2652_v14 = vld [vmem:[#allocation2 + $0x3c] sm:$0xff]  }
  0x56   : > { %v1545_v26 = vor.u32 %v1544_v29, %v1541_v25  ;;  %v1305_v50 = vor.u32 %v1303_v5, %v1301_v9  ;;  %v1571_v25 = vrot.slane %v1569_v8, 4  ;;  %v1315_v6 = vshll.u32 %v2652_v14, 16 }
  0x57   : > { %v1554_v0 = vor.u32 %v1553_v57, %v1550_v56  ;;  %v1319_v36 = vshrl.u32 %v2652_v14, 16  ;;  %v2299_v8 = vcombine.low %v2943_v19, %v2945_v21  ;;  %v2300_v19 = vcombine.low %v2950_v27, %v2965_v39 }
  0x58   : > { %2479 = vmatmul.mubr.msk.bf16.gmra.mxu1 %vm260_vm2, %v923_v33  ;;  %v1287_v33 = vshrl.u32 %v2644_v62, 16  ;;  %v1546_v60 = vsel %vm388_vm3, %v1536_v32, %v1545_v26  ;;  %v2655_v32 = vld [vmem:[#allocation2 + $0x14] sm:$0xff]  }
  0x59   : > { %2482 = vmatprep.mubr.msk.bf16.mxu1 %vm260_vm2, %v932_v28  ;;  %v1285_v28 = vrot.slane %v1283_v22, 1  ;;  %v2654_v22 = vld [vmem:[#allocation2 + $0x44] sm:$0x1f]   ;;  %v1555_v23 = vsel %vm388_vm3, %v1545_v26, %v1554_v0  ;;  %v1317_v26 = vrot.slane %v1315_v6, 1  ;;  %v1900_v56 = vshrl.u32 %v2655_v32, 16 }
  0x5a   : > { %v1323_v37 = vshll.u32 %v2654_v22, 16  ;;  %v2665_v6 = vld [vmem:[#allocation2 + $0x44] sm:$0xff]  }
  0x5b   : > { %v1289_v54 = vor.u32 %v1287_v33, %v1285_v28  ;;  %v1286_v61 = vsel %vm634_vm4, %v1281_v48, %v1285_v28  ;;  %v1902_v48 = vshll.u32 %v2655_v32, 16  ;;  %v1947_v27 = vshll.u32 %v2665_v6, 16 }
  0x5c   : > { %2501 = vmatmul.mubr.msk.bf16.gmra.mxu0 %vm260_vm2, %v2253_v44  ;;  %v3015_v44 = vld [vmem:[#allocation2 + $0x4c] sm:$0xf] }
  0x5d   : > { %2504 = vmatprep.mubr.msk.bf16.mxu0 %vm260_vm2, %v2254_v55  ;;  %v2650_v55 = vld [vmem:[#allocation2 + $0x34] sm:$0xff]   ;;  %v2289_v52 = vcombine.low %v3013_v49, %v3015_v44  ;;  %v1904_v57 = vrot.slane %v1902_v48, 1 }
  0x5e   : > { %v1307_v62 = vshll.u32 %v2650_v55, 16 }
  0x5f   : > { %v1575_v15 = vshrl.u32 %v2289_v52, 16  ;;  %v1578_v16 = vshll.u32 %v2289_v52, 16  ;;  %v1905_v52 = vor.u32 %v1904_v57, %v1900_v56 }
  0x60   : > { %2483 = vmatmul.mubr.msk.bf16.gmra.mxu1 %vm260_vm2, %v941_v63  ;;  %v1559_v63 = vrot.slane %v1557_v42, 3  ;;  %v1309_v18 = vrot.slane %v1307_v62, 1 }
  0x61   : > { %2486 = vmatprep.mubr.msk.bf16.mxu1 %vm260_vm2, %v950_v2  ;;  %v1562_v2 = vrot.slane %v1560_v45, 4  ;;  %v1577_v30 = vrot.slane %v1575_v15, 3  ;;  %v2656_v45 = vld [vmem:[#allocation2 + $0x1c] sm:$0xff]  }
  0x62   : > { %v1310_v35 = vsel %vm634_vm4, %v1305_v50, %v1309_v18  ;;  %v1907_v58 = vshll.u32 %v2656_v45, 16 }
  0x64   : > { %2505 = vmatmul.mubr.msk.bf16.gmra.mxu0 %vm260_vm2, %v2255_v12  ;;  %v1563_v12 = vor.u32 %v1562_v2, %v1559_v63  ;;  %v2658_v63 = vld [vmem:[#allocation2 + $0x24] sm:$0xff]   ;;  %v1327_v2 = vshrl.u32 %v2654_v22, 16 }
  0x65   : > { %2528 = vmatprep.mubr.msk.bf16.mxu0 %vm260_vm2, %v1528_v24  ;;  %v1568_v24 = vrot.slane %v1566_v7, 3 }
  0x66   : > { %v1564_v29 = vsel %vm388_vm3, %v1554_v0, %v1563_v12  ;;  %v1919_v0 = vshrl.u32 %v2658_v63, 16 }
  0x67   : > { %v1572_v28 = vor.u32 %v1571_v25, %v1568_v24  ;;  %v2301_v25 = vcombine.low %v2967_v41, %v2971_v46  ;;  %v2302_v41 = vcombine.low %v2973_v51, %v2988_v10  ;;  %v2304_v10 = vcombine.low %v2997_v13, %v3007_v38 }
  0x68   : > { %2487 = vmatmul.mubr.msk.bf16.gmra.mxu1 %vm260_vm2, %v949_v20  ;;  %v1293_v20 = vrot.slane %v1291_v34, 1  ;;  %v1311_v34 = vshrl.u32 %v2650_v55, 16 }
  0x69   : > { %2510 = vmatprep.mubr.msk.bf16.mxu1 %vm260_vm2, %v1278_v31  ;;  %v1580_v31 = vrot.slane %v1578_v16, 4 }
  0x6a   : > { %v1294_v4 = vsel %vm634_vm4, %v1289_v54, %v1293_v20  ;;  %v1297_v17 = vor.u32 %v1295_v3, %v1293_v20  ;;  %v1325_v54 = vrot.slane %v1323_v37, 1  ;;  %v1573_v20 = vsel %vm388_vm3, %v1563_v12, %v1572_v28  ;;  %v2659_v3 = vld [vmem:[#allocation2 + $0x2c] sm:$0xff]   ;;  %v2661_v12 = vld [vmem:[#allocation2 + $0x34] sm:$0xff]  }
  0x6b   : > { %v1581_v42 = vor.u32 %v1580_v31, %v1577_v30  ;;  %v1923_v7 = vshll.u32 %v2659_v3, 16  ;;  %v1931_v50 = vshll.u32 %v2661_v12, 16  ;;  %v1927_v22 = vshrl.u32 %v2659_v3, 16 }
  0x6c   : > { %2529 = vmatmul.mubr.msk.bf16.vlgmr.msra.gmra.mxu0 %vm260_vm2, %v1537_v53  ;;  %v1302_v33 = vsel %vm634_vm4, %v1297_v17, %v1301_v9  ;;  %v1313_v53 = vor.u32 %v1311_v34, %v1309_v18  ;;  %v1329_v5 = vor.u32 %v1327_v2, %v1325_v54  ;;  %v2663_v17 = vld [vmem:[#allocation2 + $0x3c] sm:$0xff]   ;;  %v2303_v37 = vcombine.low %v2990_v11, %v2995_v1 }
  0x6d   : > { %2563 = vmatpush3.bf16.msra.mxu0 %v1987_v40  ;;  %2532 = vmatprep.mubr.msk.bf16.mxu0 %vm260_vm2, %v1546_v60  ;;  %v1321_v40 = vor.u32 %v1319_v36, %v1317_v26  ;;  %v1582_v55 = vsel %vm388_vm3, %v1572_v28, %v1581_v42  ;;  %v1925_v16 = vrot.slane %v1923_v7, 1  ;;  %v1939_v24 = vshll.u32 %v2663_v17, 16 }
  0x6e   : > { %v1318_v59 = vsel %vm634_vm4, %v1313_v53, %v1317_v26  ;;  %v1943_v34 = vshrl.u32 %v2663_v17, 16  ;;  %v1949_v28 = vrot.slane %v1947_v27, 1  ;;  %v2305_v11 = vcombine.low %v3010_v47, %v3013_v49 }
  0x6f   : > { %v1326_v60 = vsel %vm634_vm4, %v1321_v40, %v1325_v54  ;;  %v1929_v30 = vor.u32 %v1927_v22, %v1925_v16  ;;  %v1941_v32 = vrot.slane %v1939_v24, 1  ;;  %v2306_v40 = vcombine.low %v3015_v44, %v3015_v44 }
  0x70   : > { %2511 = vmatmul.mubr.msk.bf16.vlgmr.msra.gmra.mxu1 %vm260_vm2, %v1286_v61  ;;  %v1909_v61 = vrot.slane %v1907_v58, 1 }
  0x71   : > { %2545 = vmatpush3.bf16.msra.mxu1 %v1742_v43  ;;  %2514 = vmatprep.mubr.msk.bf16.mxu1 %vm260_vm2, %v1294_v4  ;;  %v1915_v43 = vshll.u32 %v2658_v63, 16  ;;  %v1911_v4 = vshrl.u32 %v2656_v45, 16  ;;  %v1945_v26 = vor.u32 %v1943_v34, %v1941_v32 }
  0x72   : > { %v1910_v62 = vsel %vm634_vm4, %v1905_v52, %v1909_v61 }
  0x73   : > { %v1917_v9 = vrot.slane %v1915_v43, 1  ;;  %v1913_v14 = vor.u32 %v1911_v4, %v1909_v61  ;;  %v1950_v51 = vsel %vm634_vm4, %v1945_v26, %v1949_v28 }
  0x74   : > { %2533 = vmatmul.mubr.msk.bf16.gmra.mxu0 %vm260_vm2, %v1555_v23  ;;  %v1935_v23 = vshrl.u32 %v2661_v12, 16 }
  0x75   : > { %2536 = vmatprep.mubr.msk.bf16.mxu0 %vm260_vm2, %v1564_v29  ;;  %v1921_v15 = vor.u32 %v1919_v0, %v1917_v9  ;;  %v1918_v18 = vsel %vm634_vm4, %v1913_v14, %v1917_v9  ;;  %v1933_v29 = vrot.slane %v1931_v50, 1 }
  0x77   : > { %v1926_v21 = vsel %vm634_vm4, %v1921_v15, %v1925_v16  ;;  %v1937_v31 = vor.u32 %v1935_v23, %v1933_v29  ;;  %v1934_v39 = vsel %vm634_vm4, %v1929_v30, %v1933_v29 }
  0x78   : > { %2515 = vmatmul.mubr.msk.bf16.gmra.mxu1 %vm260_vm2, %v1302_v33  ;;  %v2667_v33 = vld [vmem:[#allocation2 + $0x4c] sm:$0x1f]  }
  0x79   : > { %2518 = vmatprep.mubr.msk.bf16.mxu1 %vm260_vm2, %v1310_v35  ;;  %v1942_v46 = vsel %vm634_vm4, %v1937_v31, %v1941_v32  ;;  %v1951_v35 = vshrl.u32 %v2665_v6, 16  ;;  %v1955_v36 = vshll.u32 %v2667_v33, 16  ;;  %v1959_v1 = vshrl.u32 %v2667_v33, 16 }
  0x7b   : > { %v1957_v45 = vrot.slane %v1955_v36, 1 }
  0x7c   : > { %2537 = vmatmul.mubr.msk.bf16.gmra.mxu0 %vm260_vm2, %v1573_v20 }
  0x7d   : > { %2540 = vmatprep.mubr.msk.bf16.mxu0 %vm260_vm2, %v1582_v55  ;;  %v1961_v53 = vor.u32 %v1959_v1, %v1957_v45 }
  0x80   : > { %2519 = vmatmul.mubr.msk.bf16.gmra.mxu1 %vm260_vm2, %v1318_v59 }
  0x81   : > { %2522 = vmatprep.mubr.msk.bf16.mxu1 %vm260_vm2, %v1326_v60 }
  0x84   : > { %2541 = vmatmul.mubr.msk.bf16.gmra.mxu0 %vm260_vm2, %v1581_v42  ;;  %v1953_v42 = vor.u32 %v1951_v35, %v1949_v28 }
  0x85   : > { %2564 = vmatprep.mubr.msk.bf16.mxu0 %vm260_vm2, %v1910_v62 }
  0x86   : > { %v1958_v48 = vsel %vm634_vm4, %v1953_v42, %v1957_v45 }
  0x88   : > { %2523 = vmatmul.mubr.msk.bf16.gmra.mxu1 %vm260_vm2, %v1329_v5 }
  0x89   : > { %2546 = vmatprep.mubr.msk.bf16.mxu1 %vm260_vm2, %v2299_v8 }
  0x8c   : > { %2565 = vmatmul.mubr.msk.bf16.vlgmr.msra.gmra.mxu0 %vm260_vm2, %v1918_v18 }
  0x8d   : > { %2568 = vmatprep.mubr.msk.bf16.mxu0 %vm260_vm2, %v1926_v21 }
  0x90   : > { %2547 = vmatmul.mubr.msk.bf16.vlgmr.msra.gmra.mxu1 %vm260_vm2, %v2300_v19 }
  0x91   : > { %2550 = vmatprep.mubr.msk.bf16.mxu1 %vm260_vm2, %v2301_v25 }
  0x94   : > { %2569 = vmatmul.mubr.msk.bf16.gmra.mxu0 %vm260_vm2, %v1934_v39 }
  0x95   : > { %2572 = vmatprep.mubr.msk.bf16.mxu0 %vm260_vm2, %v1942_v46 }
  0x98   : > { %2551 = vmatmul.mubr.msk.bf16.gmra.mxu1 %vm260_vm2, %v2302_v41 }
  0x99   : > { %2554 = vmatprep.mubr.msk.bf16.mxu1 %vm260_vm2, %v2303_v37 }
  0x9c   : > { %2573 = vmatmul.mubr.msk.bf16.gmra.mxu0 %vm260_vm2, %v1950_v51 }
  0x9d   : > { %2576 = vmatprep.mubr.msk.bf16.mxu0 %vm260_vm2, %v1958_v48 }
  0xa0   : > { %2555 = vmatmul.mubr.msk.bf16.gmra.mxu1 %vm260_vm2, %v2304_v10 }
  0xa1   : > { %2558 = vmatprep.mubr.msk.bf16.mxu1 %vm260_vm2, %v2305_v11 }
  0xa4   : > { %2577 = vmatmul.mubr.msk.bf16.gmra.mxu0 %vm260_vm2, %v1961_v53 }
  0xa8   : > { %2559 = vmatmul.mubr.msk.bf16.gmra.mxu1 %vm260_vm2, %v2306_v40 }
  0xdc   : > { %v2422_v13 = vpop.f32.mrf.mxu0 }
  0xde   : > { %v323_v47 = vpop.f32.mrf.mxu0 }
  0xe0   : > { %v2430_v38 = vpop.f32.mrf.mxu1  ;;  %v2423_v54 = vpop.f32.mrf.mxu0 }
  0xe2   : > { %v351_v49 = vpop.f32.mrf.mxu1  ;;  %v326_v55 = vpop.f32.mrf.mxu0 }
  0xe4   : > { %v2431_v20 = vpop.f32.mrf.mxu1  ;;  %v2426_v57 = vpop.f32.mrf.mxu0 }
  0xe6   : > { %v354_v56 = vpop.f32.mrf.mxu1  ;;  %v337_v59 = vpop.f32.mrf.mxu0 }
  0xe8   : > { %v2434_v58 = vpop.f32.mrf.mxu1  ;;  %v2427_v63 = vpop.f32.mrf.mxu0 }
  0xea   : > { %v365_v60 = vpop.f32.mrf.mxu1  ;;  %v340_v52 = vpop.f32.mrf.mxu0 }
  0xec   : > { %v2435_v2 = vpop.f32.mrf.mxu1  ;;  %v2458_v61 = vpop.f32.mrf.mxu0 }
  0xee   : > { %v368_v44 = vpop.f32.mrf.mxu1  ;;  %v759_v43 = vpop.f32.mrf.mxu0 }
  0xf0   : > { %v2440_v3 = vpop.f32.mrf.mxu1  ;;  %v2459_v62 = vpop.f32.mrf.mxu0 }
  0xf1   : > { %v529_v4 = vadd.f32 %v2440_v3, %v2422_v13 }
  0xf2   : > { %v521_v5 = vpop.f32.mrf.mxu1  ;;  %v762_v9 = vpop.f32.mrf.mxu0 }
  0xf3   : > { %v522_v0 = vadd.f32 %v521_v5, %v323_v47  ;;  %v3090_v7 = vadd.f32 %v2458_v61, %v529_v4 }
  0xf4   : > { %v2441_v8 = vpop.f32.mrf.mxu1  ;;  %v2462_v15 = vpop.f32.mrf.mxu0 }
  0xf5   : > { %v3092_v12 = vadd.f32 %v759_v43, %v522_v0 }
  0xf6   : > { %v524_v14 = vpop.f32.mrf.mxu1  ;;  %v773_v17 = vpop.f32.mrf.mxu0 }
  0xf8   : > { %v2444_v16 = vpop.f32.mrf.mxu1  ;;  %v2463_v22 = vpop.f32.mrf.mxu0 }
  0xf9   : > { %v543_v50 = vadd.f32 %v2444_v16, %v2426_v57 }
  0xfa   : > { %v535_v18 = vpop.f32.mrf.mxu1  ;;  %v776_v24 = vpop.f32.mrf.mxu0 }
  0xfb   : > { %v536_v19 = vadd.f32 %v535_v18, %v337_v59  ;;  %v3094_v21 = vadd.f32 %v2462_v15, %v543_v50 }
  0xfc   : > { %v2445_v23 = vpop.f32.mrf.mxu1  ;;  %v2466_v6 = vpop.f32.mrf.mxu0 }
  0xfd   : > { %v3096_v25 = vadd.f32 %v773_v17, %v536_v19 }
  0xfe   : > { %v538_v29 = vpop.f32.mrf.mxu1  ;;  %v787_v31 = vpop.f32.mrf.mxu0 }
 0x100   : > { %v2448_v30 = vpop.f32.mrf.mxu1  ;;  %v2467_v27 = vpop.f32.mrf.mxu0 }
 0x101   : > { %v557_v32 = vadd.f32 %v2448_v30, %v2430_v38 }
 0x102   : > { %v549_v33 = vpop.f32.mrf.mxu1  ;;  %v790_v46 = vpop.f32.mrf.mxu0 }
 0x103   : > { %v550_v39 = vadd.f32 %v549_v33, %v351_v49  ;;  %v3098_v34 = vadd.f32 %v2466_v6, %v557_v32 }
 0x104   : > { %v2449_v41 = vpop.f32.mrf.mxu1  ;;  %v2470_v37 = vpop.f32.mrf.mxu0 }
 0x105   : > { %v3100_v35 = vadd.f32 %v787_v31, %v550_v39 }
 0x106   : > { %v552_v36 = vpop.f32.mrf.mxu1  ;;  %v801_v26 = vpop.f32.mrf.mxu0 }
 0x108   : > { %v2452_v28 = vpop.f32.mrf.mxu1  ;;  %v2471_v51 = vpop.f32.mrf.mxu0 }
 0x109   : > { %v571_v42 = vadd.f32 %v2452_v28, %v2434_v58 }
 0x10a   : > { %v563_v45 = vpop.f32.mrf.mxu1  ;;  %v804_v1 = vpop.f32.mrf.mxu0 }
 0x10b   : > { %v564_v10 = vadd.f32 %v563_v45, %v365_v60  ;;  %v3102_v48 = vadd.f32 %v2470_v37, %v571_v42 }
 0x10c   : > { %v2453_v11 = vpop.f32.mrf.mxu1  ;;  %v2494_v13 = vpop.f32.mrf.mxu0 }
 0x10d   : > { %v3104_v53 = vadd.f32 %v801_v26, %v564_v10 }
 0x10e   : > { %v566_v40 = vpop.f32.mrf.mxu1  ;;  %v3106_v47 = vpop.f32.mrf.mxu0 }
 0x110   : > { %v2476_v38 = vpop.f32.mrf.mxu1  ;;  %v2495_v54 = vpop.f32.mrf.mxu0 }
 0x111   : > { %v1068_v40 = vadd.f32 %v2476_v38, %v3090_v7 }
 0x112   : > { %v1012_v49 = vpop.f32.mrf.mxu1  ;;  %v1149_v55 = vpop.f32.mrf.mxu0 }
 0x113   : > { %v1067_v55 = vadd.f32 %v1012_v49, %v3092_v12 }
 0x114   : > { %v2477_v20 = vpop.f32.mrf.mxu1  ;;  %v3108_v57 = vpop.f32.mrf.mxu0 }
 0x116   : > { %v1015_v56 = vpop.f32.mrf.mxu1  ;;  %v3110_v59 = vpop.f32.mrf.mxu0 }
 0x118   : > { %v2480_v58 = vpop.f32.mrf.mxu1  ;;  %v2499_v63 = vpop.f32.mrf.mxu0 }
 0x119   : > { %v1070_v7 = vadd.f32 %v2480_v58, %v3094_v21 }
 0x11a   : > { %v1026_v60 = vpop.f32.mrf.mxu1  ;;  %v1163_v52 = vpop.f32.mrf.mxu0 }
 0x11b   : > { %v1069_v12 = vadd.f32 %v1026_v60, %v3096_v25 }
 0x11c   : > { %v2481_v2 = vpop.f32.mrf.mxu1  ;;  %v3112_v61 = vpop.f32.mrf.mxu0 }
 0x11d   : > { %v1202_v2 = vadd.f32 %v2494_v13, %v1068_v40  ;;  %v1204_v13 = vadd.f32 %v3108_v57, %v1070_v7 }
 0x11e   : > { %v1029_v44 = vpop.f32.mrf.mxu1  ;;  %v3116_v43 = vpop.f32.mrf.mxu0 }
 0x120   : > { %v3114_v3 = vpop.f32.mrf.mxu1  ;;  %v2503_v5 = vpop.f32.mrf.mxu0 }
 0x121   : > { %v1072_v57 = vadd.f32 %v3114_v3, %v3098_v34 }
 0x122   : > { %v3118_v4 = vpop.f32.mrf.mxu1  ;;  %v1177_v0 = vpop.f32.mrf.mxu0 }
 0x124   : > { %v2485_v62 = vpop.f32.mrf.mxu1  ;;  %v3120_v9 = vpop.f32.mrf.mxu0 }
 0x125   : > { %v1201_v62 = vadd.f32 %v3106_v47, %v1067_v55  ;;  %v3153_v47 = vld [vmem:[%s3212_s2] ss:$0 sm:$0xff] }
 0x126   : > { %v1043_v8 = vpop.f32.mrf.mxu1  ;;  %v3124_v15 = vpop.f32.mrf.mxu0 }
 0x128   : > { %v3122_v14 = vpop.f32.mrf.mxu1  ;;  %v2507_v17 = vpop.f32.mrf.mxu0 }
 0x12a   : > { %v3126_v16 = vpop.f32.mrf.mxu1  ;;  %v1191_v18 = vpop.f32.mrf.mxu0 }
 0x12c   : > { %v2489_v50 = vpop.f32.mrf.mxu1  ;;  %v2530_v19 = vpop.f32.mrf.mxu0 }
 0x12e   : > { %v1057_v22 = vpop.f32.mrf.mxu1  ;;  %v1644_v24 = vpop.f32.mrf.mxu0 }
 0x130   : > { %v2512_v23 = vpop.f32.mrf.mxu1  ;;  %v2531_v6 = vpop.f32.mrf.mxu0 }
 0x131   : > { %v1447_v5 = vadd.f32 %v2512_v23, %v1202_v2 }
 0x132   : > { %v1391_v29 = vpop.f32.mrf.mxu1  ;;  %v1647_v31 = vpop.f32.mrf.mxu0 }
 0x133   : > { %v1446_v38 = vadd.f32 %v1391_v29, %v1201_v62  ;;  %v1700_v49 = vadd.f32 %v2530_v19, %v1447_v5  ;;  %v1203_v29 = vadd.f32 %v3110_v59, %v1069_v12 }
 0x134   : > { %v2513_v30 = vpop.f32.mrf.mxu1  ;;  %v2534_v33 = vpop.f32.mrf.mxu0 }
 0x135   : > { %v1699_v30 = vadd.f32 %v1644_v24, %v1446_v38 }
 0x136   : > { %v1394_v32 = vpop.f32.mrf.mxu1  ;;  %v3128_v39 = vpop.f32.mrf.mxu0 }
 0x138   : > { %v2516_v27 = vpop.f32.mrf.mxu1  ;;  %v2535_v46 = vpop.f32.mrf.mxu0 }
 0x139   : > { %v1449_v58 = vadd.f32 %v2516_v27, %v1204_v13 }
 0x13a   : > { %v1405_v41 = vpop.f32.mrf.mxu1  ;;  %v1661_v37 = vpop.f32.mrf.mxu0 }
 0x13b   : > { %v1448_v32 = vadd.f32 %v1405_v41, %v1203_v29  ;;  %v1702_v3 = vadd.f32 %v2534_v33, %v1449_v58 }
 0x13c   : > { %v2517_v36 = vpop.f32.mrf.mxu1  ;;  %v3130_v26 = vpop.f32.mrf.mxu0 }
 0x13d   : > { %v1071_v36 = vadd.f32 %v3118_v4, %v3100_v35  ;;  %v1701_v40 = vadd.f32 %v3128_v39, %v1448_v32 }
 0x13e   : > { %v1408_v28 = vpop.f32.mrf.mxu1  ;;  %v3132_v45 = vpop.f32.mrf.mxu0 }
 0x140   : > { %v2520_v42 = vpop.f32.mrf.mxu1  ;;  %v2539_v10 = vpop.f32.mrf.mxu0 }
 0x141   : > { %v1206_v10 = vadd.f32 %v3112_v61, %v1072_v57  ;;  %v1074_v61 = vadd.f32 %v3122_v14, %v3102_v48 }
 0x142   : > { %v3134_v51 = vpop.f32.mrf.mxu1  ;;  %v1675_v1 = vpop.f32.mrf.mxu0 }
 0x143   : > { %v1451_v2 = vadd.f32 %v2520_v42, %v1206_v10  ;;  %v1208_v48 = vadd.f32 %v3120_v9, %v1074_v61 }
 0x144   : > { %v2521_v11 = vpop.f32.mrf.mxu1  ;;  %v3137_v20 = vpop.f32.mrf.mxu0 }
 0x146   : > { %v1422_v54 = vpop.f32.mrf.mxu1  ;;  %v3142_v63 = vpop.f32.mrf.mxu0 }
 0x148   : > { %v3140_v56 = vpop.f32.mrf.mxu1  ;;  %v2543_v44 = vpop.f32.mrf.mxu0 }
 0x149   : > { %v1205_v44 = vadd.f32 %v3116_v43, %v1071_v36  ;;  %v1073_v43 = vadd.f32 %v3126_v16, %v3104_v53  ;;  %v1453_v13 = vadd.f32 %v3140_v56, %v1208_v48 }
 0x14a   : > { %v3144_v52 = vpop.f32.mrf.mxu1  ;;  %v1689_v8 = vpop.f32.mrf.mxu0 }
 0x14b   : > { %v1450_v62 = vadd.f32 %v3134_v51, %v1205_v44  ;;  %v1207_v53 = vadd.f32 %v3124_v15, %v1073_v43  ;;  %v1706_v15 = vadd.f32 %v3137_v20, %v1453_v13 }
 0x14c   : > { %v2525_v0 = vpop.f32.mrf.mxu1  ;;  %v2566_v50 = vpop.f32.mrf.mxu0 }
 0x14d   : > { %v1452_v9 = vadd.f32 %v3144_v52, %v1207_v53 }
 0x14e   : > { %v1436_v17 = vpop.f32.mrf.mxu1  ;;  %v2023_v22 = vpop.f32.mrf.mxu0 }
 0x14f   : > { %v1704_v17 = vadd.f32 %v3130_v26, %v1451_v2  ;;  %v1705_v52 = vadd.f32 %v3142_v63, %v1452_v9 }
 0x150   : > { %v2548_v18 = vpop.f32.mrf.mxu1  ;;  %v2567_v21 = vpop.f32.mrf.mxu0 }
 0x151   : > { %v1834_v6 = vadd.f32 %v2548_v18, %v1700_v49  ;;  %v1703_v49 = vadd.f32 %v3132_v45, %v1450_v62 }
 0x152   : > { %v1778_v23 = vpop.f32.mrf.mxu1  ;;  %v2026_v19 = vpop.f32.mrf.mxu0 }
 0x153   : > { %v2079_v31 = vadd.f32 %v2566_v50, %v1834_v6  ;;  %v1833_v25 = vadd.f32 %v1778_v23, %v1699_v30 }
 0x154   : > { %v2549_v60 = vpop.f32.mrf.mxu1  ;;  %v2570_v59 = vpop.f32.mrf.mxu0 }
 0x155   : > { %v2095_v24 = vadd.f32 %v3153_v47, %v2079_v31  ;;  %v2078_v46 = vadd.f32 %v2023_v22, %v1833_v25 }
 0x156   : > { %v1781_v27 = vpop.f32.mrf.mxu1  ;;  %v2037_v28 = vpop.f32.mrf.mxu0 }
 0x157   : > { %v2096_v37 = vpack.c.bf16 %v2095_v24, %v2095_v24  ;;  %v2092_v34 = vadd.f32 %v3153_v47, %v2078_v46 }
 0x158   : > { %v2552_v41 = vpop.f32.mrf.mxu1  ;;  %v2571_v55 = vpop.f32.mrf.mxu0 }
 0x159   : > { %2097 = vst.msk [vmem:[%s3164_s16 + $0x4] sm:$0xf] %vm181_vm1, %v2096_v37  ;;  %v2093_v11 = vpack.c.bf16 %v2092_v34, %v2092_v34  ;;  %v1836_v1 = vadd.f32 %v2552_v41, %v1702_v3 }
 0x15a   : > { %v1792_v54 = vpop.f32.mrf.mxu1  ;;  %v2040_v5 = vpop.f32.mrf.mxu0 }
 0x15b   : > { %2094 = vst.msk [vmem:[%s3164_s16] sm:$0xf] %vm181_vm1, %v2093_v11  ;;  %v2081_v35 = vadd.f32 %v2570_v59, %v1836_v1  ;;  %v1835_v4 = vadd.f32 %v1792_v54, %v1701_v40 }
 0x15c   : > { %v2553_v33 = vpop.f32.mrf.mxu1  ;;  %v2574_v7 = vpop.f32.mrf.mxu0 }
 0x15d   : > { %v2101_v0 = vadd.f32 %v3153_v47, %v2081_v35  ;;  %v2080_v39 = vadd.f32 %v2037_v28, %v1835_v4 }
 0x15e   : > { %v1795_v8 = vpop.f32.mrf.mxu1  ;;  %v2051_v12 = vpop.f32.mrf.mxu0 }
 0x15f   : > { %v2102_v42 = vpack.c.bf16 %v2101_v0, %v2101_v0  ;;  %v2098_v38 = vadd.f32 %v3153_v47, %v2080_v39 }
 0x160   : > { %v2556_v50 = vpop.f32.mrf.mxu1  ;;  %v2575_v22 = vpop.f32.mrf.mxu0 }
 0x161   : > { %2103 = vst.msk [vmem:[%s3164_s16 + $0xc] sm:$0xf] %vm181_vm1, %v2102_v42  ;;  %v2099_v14 = vpack.c.bf16 %v2098_v38, %v2098_v38  ;;  %v1838_v51 = vadd.f32 %v2556_v50, %v1704_v17 }
 0x162   : > { %v1806_v18 = vpop.f32.mrf.mxu1  ;;  %v2054_v30 = vpop.f32.mrf.mxu0 }
 0x163   : > { %2100 = vst.msk [vmem:[%s3164_s16 + $0x8] sm:$0xf] %vm181_vm1, %v2099_v14  ;;  %v2083_v16 = vadd.f32 %v2574_v7, %v1838_v51  ;;  %v1837_v26 = vadd.f32 %v1806_v18, %v1703_v49 }
 0x164   : > { %v2557_v6 = vpop.f32.mrf.mxu1  ;;  %v2578_v58 = vpop.f32.mrf.mxu0 }
 0x165   : > { %v2107_v23 = vadd.f32 %v3153_v47, %v2083_v16  ;;  %v2082_v21 = vadd.f32 %v2051_v12, %v1837_v26 }
 0x166   : > { %v1809_v45 = vpop.f32.mrf.mxu1  ;;  %v2065_v25 = vpop.f32.mrf.mxu0 }
 0x167   : > { %v2108_v29 = vpack.c.bf16 %v2107_v23, %v2107_v23  ;;  %v2104_v56 = vadd.f32 %v3153_v47, %v2082_v21 }
 0x168   : > { %v2560_v31 = vpop.f32.mrf.mxu1  ;;  %v2579_v32 = vpop.f32.mrf.mxu0 }
 0x169   : > { %2109 = vst.msk [vmem:[%s3164_s16 + $0x14] sm:$0xf] %vm181_vm1, %v2108_v29  ;;  %v2105_v60 = vpack.c.bf16 %v2104_v56, %v2104_v56  ;;  %v1840_v19 = vadd.f32 %v2560_v31, %v1706_v15 }
 0x16a   : > { %v1820_v57 = vpop.f32.mrf.mxu1  ;;  %v2068_v59 = vpop.f32.mrf.mxu0 }
 0x16b   : > { %2106 = vst.msk [vmem:[%s3164_s16 + $0x10] sm:$0xf] %vm181_vm1, %v2105_v60  ;;  %v2085_v24 = vadd.f32 %v2578_v58, %v1840_v19  ;;  %v1839_v46 = vadd.f32 %v1820_v57, %v1705_v52 }
 0x16c   : > { %v2561_v27 = vpop.f32.mrf.mxu1 }
 0x16d   : > { %v2113_v20 = vadd.f32 %v3153_v47, %v2085_v24  ;;  %v2084_v36 = vadd.f32 %v2065_v25, %v1839_v46 }
 0x16e   : > { %v1823_v37 = vpop.f32.mrf.mxu1 }
 0x16f   : > { %v2114_v34 = vpack.c.bf16 %v2113_v20, %v2113_v20  ;;  %v2110_v3 = vadd.f32 %v3153_v47, %v2084_v36 }
 0x171   : > { %2115 = vst.msk [vmem:[%s3164_s16 + $0x1c] sm:$0xf] %vm181_vm1, %v2114_v34  ;;  %v2111_v41 = vpack.c.bf16 %v2110_v3, %v2110_v3 }
 0x173   : > { %2112 = vst.msk [vmem:[%s3164_s16 + $0x18] sm:$0xf] %vm181_vm1, %v2111_v41 }
 0x174 PF: > { %s13_s12 = sadd.s32 1, %s2676_s12  }
 0x175   : > { %p10_p4 = scmp.ge.s32.totalorder %s13_s12, 4  }
 0x177   :  { %12 = sbr.rel (!%p10_p4) target bundleno = 1 (0x1), region = 70 }

</bundles_post_ra>
